<compile_context>
chip_gen: v7x
topology: tpu7x:2x2x1
jax: 0.10.0
libtpu: 0.0.40
codegen_flags: <defaults>
</compile_context>

<pallas_src>
import functools

import jax
import jax.numpy as jnp
import numpy as np
from jax.experimental import pallas as pl
from jax.experimental.pallas import tpu as pltpu


# ------------------------------- fused kernel ------------------------------- #

def _res_block_kernel(*refs, nb, cin, cout, mfr, wf, taps1, taps2, sc_tap,
                      has_proj):
    """One full residual block for `nb` images.

    Frame layout: every activation is a zero-padded image flattened to
    (channels, Hf*Wf) with Hf=Ho+2, Wf=Wo+2, plus 2*Wf zero-margin lanes on each
    side.  A 3x3 tap (di, dj) then reads the *contiguous* lane window shifted by
    (di-1)*Wf + (dj-1) — implicit im2col, no patch tensor, no strided access.
    """
    if has_proj:
        (xf_ref, w1_ref, w2_ref, ws_ref, b1_ref, b2_ref, mask_ref,
         o_ref, y1_ref) = refs
    else:
        (xf_ref, w1_ref, w2_ref, b1_ref, b2_ref, mask_ref,
         o_ref, y1_ref) = refs
        ws_ref = None

    base = 2 * wf                      # lane margin in front of the frame
    # Zero the halo margins of the conv1-output scratch once per grid step.
    zeros_margin = jnp.zeros((cout, base), y1_ref.dtype)
    y1_ref[:, :base] = zeros_margin
    y1_ref[:, base + mfr:base + mfr + base] = zeros_margin

    mask = mask_ref[...]               # (1, mfr) f32: 1 inside the image, 0 on pad ring
    b1 = b1_ref[...]                   # (cout, 1) f32
    b2 = b2_ref[...]                   # (cout, 1) f32 (shortcut bias already folded in)

    for j in range(nb):                # images of this grid step (static unroll)
        # ---- conv1: 9 shifted MXU matmuls, f32 accumulate ----
        acc1 = jnp.zeros((cout, mfr), jnp.float32)
        for t, (p, d) in enumerate(taps1):
            xs = xf_ref[j, p, :, base + d:base + d + mfr]          # (cin, mfr) bf16
            acc1 = acc1 + jnp.dot(w1_ref[t], xs,
                                  preferred_element_type=jnp.float32)
        # bias + ReLU, zero the pad ring, park in VMEM as conv2's input frame.
        y1 = jnp.maximum(acc1 + b1, 0.0) * mask
        y1_ref[:, base:base + mfr] = y1.astype(y1_ref.dtype)

        # ---- conv2 (+ fused shortcut): 9 more shifted matmuls ----
        acc2 = jnp.zeros((cout, mfr), jnp.float32)
        for t, d in enumerate(taps2):
            acc2 = acc2 + jnp.dot(w2_ref[t],
                                  y1_ref[:, base + d:base + d + mfr],
                                  preferred_element_type=jnp.float32)
        p, d = sc_tap
        if has_proj:                   # 1x1 projection shortcut = one more tap
            xs = xf_ref[j, p, :, base + d:base + d + mfr]
            acc2 = acc2 + jnp.dot(ws_ref[...], xs,
                                  preferred_element_type=jnp.float32)
        else:                          # identity shortcut: bf16 stream, widened in f32
            acc2 = acc2 + xf_ref[j, p, :, base + d:base + d + mfr].astype(
                jnp.float32)

        o_ref[j] = jnp.maximum(acc2 + b2, 0.0).astype(o_ref.dtype)


# -------------------------- VMEM / grid-step planning ------------------------ #

def _vmem_capacity_bytes():
    try:
        cap = getattr(pltpu.get_tpu_info(), "vmem_capacity_bytes", None)
        if cap:
            return int(cap)
    except Exception:
        pass
    return 64 << 20                    # v7x-sized conservative fallback


def _plan(batch, in_rows, cout, lf, mfr, weight_bytes):
    """Images per grid step + vmem_limit_bytes, sized against this chip's VMEM."""
    cap = _vmem_capacity_bytes()
    budget = (2 * cap) // 5            # keep blocks + scratch well under physical VMEM

    def usage(nb):
        x_blk = 2 * nb * in_rows * lf * 2          # bf16 input frames, double-buffered
        o_blk = 2 * nb * cout * mfr * 4            # f32 output block, double-buffered
        scratch = cout * lf * 2                    # bf16 y1 frame (single copy)
        return x_blk + o_blk + scratch + 2 * weight_bytes

    nb = max(1, min(batch, -(-256 // mfr)))        # aim for >=256 output lanes / step
    while nb > 1 and usage(nb) > budget:
        nb -= 1
    limit = int(min(int(0.75 * cap), max(32 << 20, 2 * usage(nb))))
    return nb, limit


# ------------------------------- block wrapper ------------------------------- #

def residual_block_forward(x, params, stride):
    """x: (B, Cin, H, W) float32 -> (B, Cout*Ho*Wo) float32 (NCHW flatten order)."""
    B, Cin, H, W = x.shape
    w1, b1 = params["conv1"]
    w2, b2 = params["conv2"]
    Cout = w1.shape[0]
    has_proj = "shortcut" in params
    assert stride in (1, 2) and H % stride == 0 and W % stride == 0

    Ho = (H + 2 - 3) // stride + 1
    Wo = (W + 2 - 3) // stride + 1
    Hf, Wf = Ho + 2, Wo + 2            # output / y1 frame incl. zero-padding ring
    Mfr = Hf * Wf
    margin = 2 * Wf                    # lane margin so every shifted window is in-bounds
    Lf = Mfr + 2 * margin
    P = stride * stride                # polyphase count (1 or 4)

    # ---- static tap tables: (phase index, lane shift) per 3x3 tap ----
    if stride == 1:
        taps1 = tuple((0, (di - 1) * Wf + (dj - 1))
                      for di in range(3) for dj in range(3))
        sc_tap = (0, 0)
    else:
        taps1 = tuple((2 * (di % 2) + (dj % 2),
                       (di // 2 - 1) * Wf + (dj // 2 - 1))
                      for di in range(3) for dj in range(3))
        sc_tap = (3, -(Wf + 1))
    taps2 = tuple((di - 1) * Wf + (dj - 1) for di in range(3) for dj in range(3))

    # ---- images per grid step & VMEM limit (generation-aware) ----
    weight_bytes = 2 * (9 * Cout * Cin + 9 * Cout * Cout
                        + (Cout * Cin if has_proj else 0))
    nb, vmem_limit = _plan(B, P * Cin, Cout, Lf, Mfr, weight_bytes)
    Bp = ((B + nb - 1) // nb) * nb

    # ---- input frames (one wrapper-side pass, no data amplification) ----
    xpad = jnp.pad(x, ((0, 0), (0, 0), (1, 1), (1, 1)))
    if stride == 1:
        frames = [xpad]                                       # (B, Cin, Hf, Wf)
    else:
        frames = [jnp.pad(xpad[:, :, pi::2, pj::2],
                          ((0, 0), (0, 0), (0, 1), (0, 1)))   # -> (B, Cin, Hf, Wf)
                  for pi in (0, 1) for pj in (0, 1)]
    xf = jnp.stack(frames, axis=1).reshape(B, P, Cin, Mfr)
    xf = jnp.pad(xf, ((0, 0), (0, 0), (0, 0), (margin, margin)))
    if Bp != B:
        xf = jnp.pad(xf, ((0, Bp - B), (0, 0), (0, 0), (0, 0)))
    xf = xf.astype(jnp.bfloat16)

    # ---- weights / biases / pad-ring mask in kernel layout ----
    w1f = w1.transpose(2, 3, 0, 1).reshape(9, Cout, Cin).astype(jnp.bfloat16)
    w2f = w2.transpose(2, 3, 0, 1).reshape(9, Cout, Cout).astype(jnp.bfloat16)
    b2t = b2
    args = [xf, w1f, w2f]
    in_specs = [
        pl.BlockSpec((nb, P, Cin, Lf), lambda b: (b, 0, 0, 0)),   # streamed frames
        pl.BlockSpec((9, Cout, Cin), lambda b: (0, 0, 0)),        # resident weights
        pl.BlockSpec((9, Cout, Cout), lambda b: (0, 0, 0)),
    ]
    if has_proj:
        ws, bs = params["shortcut"]
        args.append(ws.reshape(Cout, Cin).astype(jnp.bfloat16))
        in_specs.append(pl.BlockSpec((Cout, Cin), lambda b: (0, 0)))
        b2t = b2 + bs
    m = np.zeros((Hf, Wf), np.float32)
    m[1:1 + Ho, 1:1 + Wo] = 1.0
    args += [b1.reshape(Cout, 1).astype(jnp.float32),
             b2t.reshape(Cout, 1).astype(jnp.float32),
             jnp.asarray(m.reshape(1, Mfr))]
    in_specs += [pl.BlockSpec((Cout, 1), lambda b: (0, 0)),
                 pl.BlockSpec((Cout, 1), lambda b: (0, 0)),
                 pl.BlockSpec((1, Mfr), lambda b: (0, 0))]

    kernel = functools.partial(
        _res_block_kernel, nb=nb, cin=Cin, cout=Cout, mfr=Mfr, wf=Wf,
        taps1=taps1, taps2=taps2, sc_tap=sc_tap, has_proj=has_proj)

    # TODO(synk): single-buffer the resident weight/bias blocks
    # (pipeline_mode=pl.Buffered(1)) once verified on all target runtimes.
    out = pl.pallas_call(
        kernel,
        out_shape=jax.ShapeDtypeStruct((Bp, Cout, Mfr), jnp.float32),
        grid_spec=pltpu.PrefetchScalarGridSpec(
            num_scalar_prefetch=0,
            grid=(Bp // nb,),
            in_specs=in_specs,
            out_specs=pl.BlockSpec((nb, Cout, Mfr), lambda b: (b, 0, 0)),
            # conv1's output frame (with halo margins) never leaves VMEM.
            scratch_shapes=[pltpu.VMEM((Cout, Lf), jnp.bfloat16)]),
        compiler_params=pltpu.CompilerParams(
            dimension_semantics=("parallel",),
            vmem_limit_bytes=vmem_limit),
    )(*args)

    # Only post-processing: crop the frame interior (already batch-major NCHW).
    out = out[:B].reshape(B, Cout, Hf, Wf)[:, :, 1:1 + Ho, 1:1 + Wo]
    return out.reshape(B, Cout * Ho * Wo)


# ---------------------------- reference (pure JAX) --------------------------- #

def _conv_ref(x, w, b, stride, padding):
    y = jax.lax.conv_general_dilated(
        x, w, (stride, stride), [(padding, padding)] * 2,
        dimension_numbers=("NCHW", "OIHW", "NCHW"))
    return y + b[None, :, None, None]


def residual_block_ref(x, params, stride):
    w1, b1 = params["conv1"]
    w2, b2 = params["conv2"]
    out = jax.nn.relu(_conv_ref(x, w1, b1, stride, 1))
    out = _conv_ref(out, w2, b2, 1, 1)
    if "shortcut" in params:
        ws, bs = params["shortcut"]
        sc = _conv_ref(x, ws, bs, stride, 0)
    else:
        sc = x
    return jax.nn.relu(out + sc).reshape(x.shape[0], -1)


# ----------------------------------- main ------------------------------------ #

if __name__ == "__main__":
    keys = jax.random.split(jax.random.PRNGKey(0), 12)

    # --- Test 1: projection-shortcut block (stride 2, Cin != Cout) ---
    B, Cin, H, W = 2, 4, 16, 16
    Cout, stride = 8, 2
    x = jax.random.normal(keys[0], (B, Cin, H, W), dtype=jnp.float32)
    params = {
        "conv1": (0.1 * jax.random.normal(keys[1], (Cout, Cin, 3, 3), jnp.float32),
                  0.1 * jax.random.normal(keys[2], (Cout,), jnp.float32)),
        "conv2": (0.1 * jax.random.normal(keys[3], (Cout, Cout, 3, 3), jnp.float32),
                  0.1 * jax.random.normal(keys[4], (Cout,), jnp.float32)),
        "shortcut": (0.1 * jax.random.normal(keys[5], (Cout, Cin, 1, 1), jnp.float32),
                     0.1 * jax.random.normal(keys[6], (Cout,), jnp.float32)),
    }
    fwd = jax.jit(functools.partial(residual_block_forward, stride=stride))
    out = jax.block_until_ready(fwd(x, params))
    ref = jax.block_until_ready(residual_block_ref(x, params, stride))
    assert out.shape == (B, Cout * (H // stride) * (W // stride)), out.shape
    np.testing.assert_allclose(np.asarray(out), np.asarray(ref),
                               rtol=5e-2, atol=5e-2)

    # --- Test 2: identity-shortcut block (stride 1, Cin == Cout) ---
    B2, C2, H2, W2 = 2, 8, 8, 8
    x2 = jax.random.normal(keys[7], (B2, C2, H2, W2), dtype=jnp.float32)
    params2 = {
        "conv1": (0.1 * jax.random.normal(keys[8], (C2, C2, 3, 3), jnp.float32),
                  0.1 * jax.random.normal(keys[9], (C2,), jnp.float32)),
        "conv2": (0.1 * jax.random.normal(keys[10], (C2, C2, 3, 3), jnp.float32),
                  0.1 * jax.random.normal(keys[11], (C2,), jnp.float32)),
    }
    fwd2 = jax.jit(functools.partial(residual_block_forward, stride=1))
    out2 = jax.block_until_ready(fwd2(x2, params2))
    ref2 = jax.block_until_ready(residual_block_ref(x2, params2, 1))
    assert out2.shape == (B2, C2 * H2 * W2), out2.shape
    np.testing.assert_allclose(np.asarray(out2), np.asarray(ref2),
                               rtol=5e-2, atol=5e-2)

    print("KERNEL_OK")
</pallas_src>

<mosaic_0001>
module attributes {stable_mosaic.version = 11 : i64} {
  func.func @_res_block_kernel(%arg0: i32, %arg1: memref<2x4x4x140xbf16, #tpu.memory_space<vmem>>, %arg2: memref<9x8x4xbf16, #tpu.memory_space<vmem>>, %arg3: memref<9x8x8xbf16, #tpu.memory_space<vmem>>, %arg4: memref<8x4xbf16, #tpu.memory_space<vmem>>, %arg5: memref<8x1xf32, #tpu.memory_space<vmem>>, %arg6: memref<8x1xf32, #tpu.memory_space<vmem>>, %arg7: memref<1x100xf32, #tpu.memory_space<vmem>>, %arg8: memref<2x8x100xf32, #tpu.memory_space<vmem>>, %arg9: memref<8x140xbf16, #tpu.memory_space<vmem>>) attributes {dimension_semantics = [#tpu.dimension_semantics<parallel>], iteration_bounds = array<i64: 1>, scalar_prefetch = 0 : i64, scratch_operands = 1 : i64, tpu.core_type = #tpu.core_type<tc>, window_params = [{transform_indices = @transform_0, window_bounds = array<i64: 2, 4, 4, 140>}, {pipeline_mode = #tpu.pipeline_mode<synchronous>, transform_indices = @transform_1, window_bounds = array<i64: 9, 8, 4>}, {pipeline_mode = #tpu.pipeline_mode<synchronous>, transform_indices = @transform_2, window_bounds = array<i64: 9, 8, 8>}, {pipeline_mode = #tpu.pipeline_mode<synchronous>, transform_indices = @transform_3, window_bounds = array<i64: 8, 4>}, {pipeline_mode = #tpu.pipeline_mode<synchronous>, transform_indices = @transform_4, window_bounds = array<i64: 8, 1>}, {pipeline_mode = #tpu.pipeline_mode<synchronous>, transform_indices = @transform_5, window_bounds = array<i64: 8, 1>}, {pipeline_mode = #tpu.pipeline_mode<synchronous>, transform_indices = @transform_6, window_bounds = array<i64: 1, 100>}, {transform_indices = @transform_7, window_bounds = array<i64: 2, 8, 100>}]} {
    %cst = arith.constant 0.000000e+00 : bf16
    %0 = vector.broadcast %cst : bf16 to vector<8x20xbf16>
    %c0 = arith.constant 0 : index
    %c0_0 = arith.constant 0 : index
    %1 = vector.load %arg9[%c0, %c0_0] : memref<8x140xbf16, #tpu.memory_space<vmem>>, vector<8x20xbf16>
    tpu.vector_store %arg9[%c0, %c0_0], %0 {strides = array<i32>} : memref<8x140xbf16, #tpu.memory_space<vmem>>, vector<8x20xbf16>,
    %c0_1 = arith.constant 0 : index
    %c120 = arith.constant 120 : index
    %2 = vector.load %arg9[%c0_1, %c120] : memref<8x140xbf16, #tpu.memory_space<vmem>>, vector<8x20xbf16>
    tpu.vector_store %arg9[%c0_1, %c120], %0 {strides = array<i32>} : memref<8x140xbf16, #tpu.memory_space<vmem>>, vector<8x20xbf16>,
    %c0_2 = arith.constant 0 : index
    %c0_3 = arith.constant 0 : index
    %3 = vector.load %arg7[%c0_2, %c0_3] : memref<1x100xf32, #tpu.memory_space<vmem>>, vector<1x100xf32>
    %c0_4 = arith.constant 0 : index
    %c0_5 = arith.constant 0 : index
    %4 = vector.load %arg5[%c0_4, %c0_5] : memref<8x1xf32, #tpu.memory_space<vmem>>, vector<8x1xf32>
    %c0_6 = arith.constant 0 : index
    %c0_7 = arith.constant 0 : index
    %5 = vector.load %arg6[%c0_6, %c0_7] : memref<8x1xf32, #tpu.memory_space<vmem>>, vector<8x1xf32>
    %cst_8 = arith.constant 0.000000e+00 : f32
    %6 = vector.broadcast %cst_8 : f32 to vector<8x100xf32>
    %c0_9 = arith.constant 0 : index
    %c0_10 = arith.constant 0 : index
    %c0_11 = arith.constant 0 : index
    %c9 = arith.constant 9 : index
    %7 = vector.load %arg1[%c0_9, %c0_10, %c0_11, %c9] : memref<2x4x4x140xbf16, #tpu.memory_space<vmem>>, vector<1x1x4x100xbf16>
    %8 = vector.shape_cast %7 : vector<1x1x4x100xbf16> to vector<4x100xbf16>
    %c0_12 = arith.constant 0 : index
    %c0_13 = arith.constant 0 : index
    %c0_14 = arith.constant 0 : index
    %9 = vector.load %arg2[%c0_12, %c0_13, %c0_14] : memref<9x8x4xbf16, #tpu.memory_space<vmem>>, vector<1x8x4xbf16>
    %10 = vector.shape_cast %9 : vector<1x8x4xbf16> to vector<8x4xbf16>
    %cst_15 = arith.constant dense<0.000000e+00> : vector<8x100xf32>
    %11 = tpu.matmul %10, %8, %cst_15 {dimension_numbers = #tpu.dot_dimension_numbers<[1], [0], [0], [1], [0, 0, 1, 1], [], []>} : vector<8x4xbf16>, vector<4x100xbf16>, vector<8x100xf32> -> vector<8x100xf32>
    %12 = arith.addf %6, %11 : vector<8x100xf32>
    %c0_16 = arith.constant 0 : index
    %c1 = arith.constant 1 : index
    %c0_17 = arith.constant 0 : index
    %c9_18 = arith.constant 9 : index
    %13 = vector.load %arg1[%c0_16, %c1, %c0_17, %c9_18] : memref<2x4x4x140xbf16, #tpu.memory_space<vmem>>, vector<1x1x4x100xbf16>
    %14 = vector.shape_cast %13 : vector<1x1x4x100xbf16> to vector<4x100xbf16>
    %c1_19 = arith.constant 1 : index
    %c0_20 = arith.constant 0 : index
    %c0_21 = arith.constant 0 : index
    %15 = vector.load %arg2[%c1_19, %c0_20, %c0_21] : memref<9x8x4xbf16, #tpu.memory_space<vmem>>, vector<1x8x4xbf16>
    %16 = vector.shape_cast %15 : vector<1x8x4xbf16> to vector<8x4xbf16>
    %cst_22 = arith.constant dense<0.000000e+00> : vector<8x100xf32>
    %17 = tpu.matmul %16, %14, %cst_22 {dimension_numbers = #tpu.dot_dimension_numbers<[1], [0], [0], [1], [0, 0, 1, 1], [], []>} : vector<8x4xbf16>, vector<4x100xbf16>, vector<8x100xf32> -> vector<8x100xf32>
    %18 = arith.addf %12, %17 : vector<8x100xf32>
    %c0_23 = arith.constant 0 : index
    %c0_24 = arith.constant 0 : index
    %c0_25 = arith.constant 0 : index
    %c10 = arith.constant 10 : index
    %19 = vector.load %arg1[%c0_23, %c0_24, %c0_25, %c10] : memref<2x4x4x140xbf16, #tpu.memory_space<vmem>>, vector<1x1x4x100xbf16>
    %20 = vector.shape_cast %19 : vector<1x1x4x100xbf16> to vector<4x100xbf16>
    %c2 = arith.constant 2 : index
    %c0_26 = arith.constant 0 : index
    %c0_27 = arith.constant 0 : index
    %21 = vector.load %arg2[%c2, %c0_26, %c0_27] : memref<9x8x4xbf16, #tpu.memory_space<vmem>>, vector<1x8x4xbf16>
    %22 = vector.shape_cast %21 : vector<1x8x4xbf16> to vector<8x4xbf16>
    %cst_28 = arith.constant dense<0.000000e+00> : vector<8x100xf32>
    %23 = tpu.matmul %22, %20, %cst_28 {dimension_numbers = #tpu.dot_dimension_numbers<[1], [0], [0], [1], [0, 0, 1, 1], [], []>} : vector<8x4xbf16>, vector<4x100xbf16>, vector<8x100xf32> -> vector<8x100xf32>
    %24 = arith.addf %18, %23 : vector<8x100xf32>
    %c0_29 = arith.constant 0 : index
    %c2_30 = arith.constant 2 : index
    %c0_31 = arith.constant 0 : index
    %c9_32 = arith.constant 9 : index
    %25 = vector.load %arg1[%c0_29, %c2_30, %c0_31, %c9_32] : memref<2x4x4x140xbf16, #tpu.memory_space<vmem>>, vector<1x1x4x100xbf16>
    %26 = vector.shape_cast %25 : vector<1x1x4x100xbf16> to vector<4x100xbf16>
    %c3 = arith.constant 3 : index
    %c0_33 = arith.constant 0 : index
    %c0_34 = arith.constant 0 : index
    %27 = vector.load %arg2[%c3, %c0_33, %c0_34] : memref<9x8x4xbf16, #tpu.memory_space<vmem>>, vector<1x8x4xbf16>
    %28 = vector.shape_cast %27 : vector<1x8x4xbf16> to vector<8x4xbf16>
    %cst_35 = arith.constant dense<0.000000e+00> : vector<8x100xf32>
    %29 = tpu.matmul %28, %26, %cst_35 {dimension_numbers = #tpu.dot_dimension_numbers<[1], [0], [0], [1], [0, 0, 1, 1], [], []>} : vector<8x4xbf16>, vector<4x100xbf16>, vector<8x100xf32> -> vector<8x100xf32>
    %30 = arith.addf %24, %29 : vector<8x100xf32>
    %c0_36 = arith.constant 0 : index
    %c3_37 = arith.constant 3 : index
    %c0_38 = arith.constant 0 : index
    %c9_39 = arith.constant 9 : index
    %31 = vector.load %arg1[%c0_36, %c3_37, %c0_38, %c9_39] : memref<2x4x4x140xbf16, #tpu.memory_space<vmem>>, vector<1x1x4x100xbf16>
    %32 = vector.shape_cast %31 : vector<1x1x4x100xbf16> to vector<4x100xbf16>
    %c4 = arith.constant 4 : index
    %c0_40 = arith.constant 0 : index
    %c0_41 = arith.constant 0 : index
    %33 = vector.load %arg2[%c4, %c0_40, %c0_41] : memref<9x8x4xbf16, #tpu.memory_space<vmem>>, vector<1x8x4xbf16>
    %34 = vector.shape_cast %33 : vector<1x8x4xbf16> to vector<8x4xbf16>
    %cst_42 = arith.constant dense<0.000000e+00> : vector<8x100xf32>
    %35 = tpu.matmul %34, %32, %cst_42 {dimension_numbers = #tpu.dot_dimension_numbers<[1], [0], [0], [1], [0, 0, 1, 1], [], []>} : vector<8x4xbf16>, vector<4x100xbf16>, vector<8x100xf32> -> vector<8x100xf32>
    %36 = arith.addf %30, %35 : vector<8x100xf32>
    %c0_43 = arith.constant 0 : index
    %c2_44 = arith.constant 2 : index
    %c0_45 = arith.constant 0 : index
    %c10_46 = arith.constant 10 : index
    %37 = vector.load %arg1[%c0_43, %c2_44, %c0_45, %c10_46] : memref<2x4x4x140xbf16, #tpu.memory_space<vmem>>, vector<1x1x4x100xbf16>
    %38 = vector.shape_cast %37 : vector<1x1x4x100xbf16> to vector<4x100xbf16>
    %c5 = arith.constant 5 : index
    %c0_47 = arith.constant 0 : index
    %c0_48 = arith.constant 0 : index
    %39 = vector.load %arg2[%c5, %c0_47, %c0_48] : memref<9x8x4xbf16, #tpu.memory_space<vmem>>, vector<1x8x4xbf16>
    %40 = vector.shape_cast %39 : vector<1x8x4xbf16> to vector<8x4xbf16>
    %cst_49 = arith.constant dense<0.000000e+00> : vector<8x100xf32>
    %41 = tpu.matmul %40, %38, %cst_49 {dimension_numbers = #tpu.dot_dimension_numbers<[1], [0], [0], [1], [0, 0, 1, 1], [], []>} : vector<8x4xbf16>, vector<4x100xbf16>, vector<8x100xf32> -> vector<8x100xf32>
    %42 = arith.addf %36, %41 : vector<8x100xf32>
    %c0_50 = arith.constant 0 : index
    %c0_51 = arith.constant 0 : index
    %c0_52 = arith.constant 0 : index
    %c19 = arith.constant 19 : index
    %43 = vector.load %arg1[%c0_50, %c0_51, %c0_52, %c19] : memref<2x4x4x140xbf16, #tpu.memory_space<vmem>>, vector<1x1x4x100xbf16>
    %44 = vector.shape_cast %43 : vector<1x1x4x100xbf16> to vector<4x100xbf16>
    %c6 = arith.constant 6 : index
    %c0_53 = arith.constant 0 : index
    %c0_54 = arith.constant 0 : index
    %45 = vector.load %arg2[%c6, %c0_53, %c0_54] : memref<9x8x4xbf16, #tpu.memory_space<vmem>>, vector<1x8x4xbf16>
    %46 = vector.shape_cast %45 : vector<1x8x4xbf16> to vector<8x4xbf16>
    %cst_55 = arith.constant dense<0.000000e+00> : vector<8x100xf32>
    %47 = tpu.matmul %46, %44, %cst_55 {dimension_numbers = #tpu.dot_dimension_numbers<[1], [0], [0], [1], [0, 0, 1, 1], [], []>} : vector<8x4xbf16>, vector<4x100xbf16>, vector<8x100xf32> -> vector<8x100xf32>
    %48 = arith.addf %42, %47 : vector<8x100xf32>
    %c0_56 = arith.constant 0 : index
    %c1_57 = arith.constant 1 : index
    %c0_58 = arith.constant 0 : index
    %c19_59 = arith.constant 19 : index
    %49 = vector.load %arg1[%c0_56, %c1_57, %c0_58, %c19_59] : memref<2x4x4x140xbf16, #tpu.memory_space<vmem>>, vector<1x1x4x100xbf16>
    %50 = vector.shape_cast %49 : vector<1x1x4x100xbf16> to vector<4x100xbf16>
    %c7 = arith.constant 7 : index
    %c0_60 = arith.constant 0 : index
    %c0_61 = arith.constant 0 : index
    %51 = vector.load %arg2[%c7, %c0_60, %c0_61] : memref<9x8x4xbf16, #tpu.memory_space<vmem>>, vector<1x8x4xbf16>
    %52 = vector.shape_cast %51 : vector<1x8x4xbf16> to vector<8x4xbf16>
    %cst_62 = arith.constant dense<0.000000e+00> : vector<8x100xf32>
    %53 = tpu.matmul %52, %50, %cst_62 {dimension_numbers = #tpu.dot_dimension_numbers<[1], [0], [0], [1], [0, 0, 1, 1], [], []>} : vector<8x4xbf16>, vector<4x100xbf16>, vector<8x100xf32> -> vector<8x100xf32>
    %54 = arith.addf %48, %53 : vector<8x100xf32>
    %c0_63 = arith.constant 0 : index
    %c0_64 = arith.constant 0 : index
    %c0_65 = arith.constant 0 : index
    %c20 = arith.constant 20 : index
    %55 = vector.load %arg1[%c0_63, %c0_64, %c0_65, %c20] : memref<2x4x4x140xbf16, #tpu.memory_space<vmem>>, vector<1x1x4x100xbf16>
    %56 = vector.shape_cast %55 : vector<1x1x4x100xbf16> to vector<4x100xbf16>
    %c8 = arith.constant 8 : index
    %c0_66 = arith.constant 0 : index
    %c0_67 = arith.constant 0 : index
    %57 = vector.load %arg2[%c8, %c0_66, %c0_67] : memref<9x8x4xbf16, #tpu.memory_space<vmem>>, vector<1x8x4xbf16>
    %58 = vector.shape_cast %57 : vector<1x8x4xbf16> to vector<8x4xbf16>
    %cst_68 = arith.constant dense<0.000000e+00> : vector<8x100xf32>
    %59 = tpu.matmul %58, %56, %cst_68 {dimension_numbers = #tpu.dot_dimension_numbers<[1], [0], [0], [1], [0, 0, 1, 1], [], []>} : vector<8x4xbf16>, vector<4x100xbf16>, vector<8x100xf32> -> vector<8x100xf32>
    %60 = arith.addf %54, %59 : vector<8x100xf32>
    %61 = vector.broadcast %4 : vector<8x1xf32> to vector<8x100xf32>
    %62 = arith.addf %60, %61 : vector<8x100xf32>
    %cst_69 = arith.constant 0.000000e+00 : f32
    %63 = vector.broadcast %cst_69 : f32 to vector<8x100xf32>
    %64 = arith.maximumf %62, %63 : vector<8x100xf32>
    %65 = vector.broadcast %3 : vector<1x100xf32> to vector<8x100xf32>
    %66 = arith.mulf %64, %65 : vector<8x100xf32>
    %67 = arith.truncf %66 : vector<8x100xf32> to vector<8x100xbf16>
    %c0_70 = arith.constant 0 : index
    %c20_71 = arith.constant 20 : index
    %68 = vector.load %arg9[%c0_70, %c20_71] : memref<8x140xbf16, #tpu.memory_space<vmem>>, vector<8x100xbf16>
    tpu.vector_store %arg9[%c0_70, %c20_71], %67 {strides = array<i32>} : memref<8x140xbf16, #tpu.memory_space<vmem>>, vector<8x100xbf16>,
    %cst_72 = arith.constant 0.000000e+00 : f32
    %69 = vector.broadcast %cst_72 : f32 to vector<8x100xf32>
    %c0_73 = arith.constant 0 : index
    %c0_74 = arith.constant 0 : index
    %c0_75 = arith.constant 0 : index
    %70 = vector.load %arg3[%c0_73, %c0_74, %c0_75] : memref<9x8x8xbf16, #tpu.memory_space<vmem>>, vector<1x8x8xbf16>
    %71 = vector.shape_cast %70 : vector<1x8x8xbf16> to vector<8x8xbf16>
    %c0_76 = arith.constant 0 : index
    %c9_77 = arith.constant 9 : index
    %72 = vector.load %arg9[%c0_76, %c9_77] : memref<8x140xbf16, #tpu.memory_space<vmem>>, vector<8x100xbf16>
    %cst_78 = arith.constant dense<0.000000e+00> : vector<8x100xf32>
    %73 = tpu.matmul %71, %72, %cst_78 {dimension_numbers = #tpu.dot_dimension_numbers<[1], [0], [0], [1], [0, 0, 1, 1], [], []>} : vector<8x8xbf16>, vector<8x100xbf16>, vector<8x100xf32> -> vector<8x100xf32>
    %74 = arith.addf %69, %73 : vector<8x100xf32>
    %c1_79 = arith.constant 1 : index
    %c0_80 = arith.constant 0 : index
    %c0_81 = arith.constant 0 : index
    %75 = vector.load %arg3[%c1_79, %c0_80, %c0_81] : memref<9x8x8xbf16, #tpu.memory_space<vmem>>, vector<1x8x8xbf16>
    %76 = vector.shape_cast %75 : vector<1x8x8xbf16> to vector<8x8xbf16>
    %c0_82 = arith.constant 0 : index
    %c10_83 = arith.constant 10 : index
    %77 = vector.load %arg9[%c0_82, %c10_83] : memref<8x140xbf16, #tpu.memory_space<vmem>>, vector<8x100xbf16>
    %cst_84 = arith.constant dense<0.000000e+00> : vector<8x100xf32>
    %78 = tpu.matmul %76, %77, %cst_84 {dimension_numbers = #tpu.dot_dimension_numbers<[1], [0], [0], [1], [0, 0, 1, 1], [], []>} : vector<8x8xbf16>, vector<8x100xbf16>, vector<8x100xf32> -> vector<8x100xf32>
    %79 = arith.addf %74, %78 : vector<8x100xf32>
    %c2_85 = arith.constant 2 : index
    %c0_86 = arith.constant 0 : index
    %c0_87 = arith.constant 0 : index
    %80 = vector.load %arg3[%c2_85, %c0_86, %c0_87] : memref<9x8x8xbf16, #tpu.memory_space<vmem>>, vector<1x8x8xbf16>
    %81 = vector.shape_cast %80 : vector<1x8x8xbf16> to vector<8x8xbf16>
    %c0_88 = arith.constant 0 : index
    %c11 = arith.constant 11 : index
    %82 = vector.load %arg9[%c0_88, %c11] : memref<8x140xbf16, #tpu.memory_space<vmem>>, vector<8x100xbf16>
    %cst_89 = arith.constant dense<0.000000e+00> : vector<8x100xf32>
    %83 = tpu.matmul %81, %82, %cst_89 {dimension_numbers = #tpu.dot_dimension_numbers<[1], [0], [0], [1], [0, 0, 1, 1], [], []>} : vector<8x8xbf16>, vector<8x100xbf16>, vector<8x100xf32> -> vector<8x100xf32>
    %84 = arith.addf %79, %83 : vector<8x100xf32>
    %c3_90 = arith.constant 3 : index
    %c0_91 = arith.constant 0 : index
    %c0_92 = arith.constant 0 : index
    %85 = vector.load %arg3[%c3_90, %c0_91, %c0_92] : memref<9x8x8xbf16, #tpu.memory_space<vmem>>, vector<1x8x8xbf16>
    %86 = vector.shape_cast %85 : vector<1x8x8xbf16> to vector<8x8xbf16>
    %c0_93 = arith.constant 0 : index
    %c19_94 = arith.constant 19 : index
    %87 = vector.load %arg9[%c0_93, %c19_94] : memref<8x140xbf16, #tpu.memory_space<vmem>>, vector<8x100xbf16>
    %cst_95 = arith.constant dense<0.000000e+00> : vector<8x100xf32>
    %88 = tpu.matmul %86, %87, %cst_95 {dimension_numbers = #tpu.dot_dimension_numbers<[1], [0], [0], [1], [0, 0, 1, 1], [], []>} : vector<8x8xbf16>, vector<8x100xbf16>, vector<8x100xf32> -> vector<8x100xf32>
    %89 = arith.addf %84, %88 : vector<8x100xf32>
    %c4_96 = arith.constant 4 : index
    %c0_97 = arith.constant 0 : index
    %c0_98 = arith.constant 0 : index
    %90 = vector.load %arg3[%c4_96, %c0_97, %c0_98] : memref<9x8x8xbf16, #tpu.memory_space<vmem>>, vector<1x8x8xbf16>
    %91 = vector.shape_cast %90 : vector<1x8x8xbf16> to vector<8x8xbf16>
    %c0_99 = arith.constant 0 : index
    %c20_100 = arith.constant 20 : index
    %92 = vector.load %arg9[%c0_99, %c20_100] : memref<8x140xbf16, #tpu.memory_space<vmem>>, vector<8x100xbf16>
    %cst_101 = arith.constant dense<0.000000e+00> : vector<8x100xf32>
    %93 = tpu.matmul %91, %92, %cst_101 {dimension_numbers = #tpu.dot_dimension_numbers<[1], [0], [0], [1], [0, 0, 1, 1], [], []>} : vector<8x8xbf16>, vector<8x100xbf16>, vector<8x100xf32> -> vector<8x100xf32>
    %94 = arith.addf %89, %93 : vector<8x100xf32>
    %c5_102 = arith.constant 5 : index
    %c0_103 = arith.constant 0 : index
    %c0_104 = arith.constant 0 : index
    %95 = vector.load %arg3[%c5_102, %c0_103, %c0_104] : memref<9x8x8xbf16, #tpu.memory_space<vmem>>, vector<1x8x8xbf16>
    %96 = vector.shape_cast %95 : vector<1x8x8xbf16> to vector<8x8xbf16>
    %c0_105 = arith.constant 0 : index
    %c21 = arith.constant 21 : index
    %97 = vector.load %arg9[%c0_105, %c21] : memref<8x140xbf16, #tpu.memory_space<vmem>>, vector<8x100xbf16>
    %cst_106 = arith.constant dense<0.000000e+00> : vector<8x100xf32>
    %98 = tpu.matmul %96, %97, %cst_106 {dimension_numbers = #tpu.dot_dimension_numbers<[1], [0], [0], [1], [0, 0, 1, 1], [], []>} : vector<8x8xbf16>, vector<8x100xbf16>, vector<8x100xf32> -> vector<8x100xf32>
    %99 = arith.addf %94, %98 : vector<8x100xf32>
    %c6_107 = arith.constant 6 : index
    %c0_108 = arith.constant 0 : index
    %c0_109 = arith.constant 0 : index
    %100 = vector.load %arg3[%c6_107, %c0_108, %c0_109] : memref<9x8x8xbf16, #tpu.memory_space<vmem>>, vector<1x8x8xbf16>
    %101 = vector.shape_cast %100 : vector<1x8x8xbf16> to vector<8x8xbf16>
    %c0_110 = arith.constant 0 : index
    %c29 = arith.constant 29 : index
    %102 = vector.load %arg9[%c0_110, %c29] : memref<8x140xbf16, #tpu.memory_space<vmem>>, vector<8x100xbf16>
    %cst_111 = arith.constant dense<0.000000e+00> : vector<8x100xf32>
    %103 = tpu.matmul %101, %102, %cst_111 {dimension_numbers = #tpu.dot_dimension_numbers<[1], [0], [0], [1], [0, 0, 1, 1], [], []>} : vector<8x8xbf16>, vector<8x100xbf16>, vector<8x100xf32> -> vector<8x100xf32>
    %104 = arith.addf %99, %103 : vector<8x100xf32>
    %c7_112 = arith.constant 7 : index
    %c0_113 = arith.constant 0 : index
    %c0_114 = arith.constant 0 : index
    %105 = vector.load %arg3[%c7_112, %c0_113, %c0_114] : memref<9x8x8xbf16, #tpu.memory_space<vmem>>, vector<1x8x8xbf16>
    %106 = vector.shape_cast %105 : vector<1x8x8xbf16> to vector<8x8xbf16>
    %c0_115 = arith.constant 0 : index
    %c30 = arith.constant 30 : index
    %107 = vector.load %arg9[%c0_115, %c30] : memref<8x140xbf16, #tpu.memory_space<vmem>>, vector<8x100xbf16>
    %cst_116 = arith.constant dense<0.000000e+00> : vector<8x100xf32>
    %108 = tpu.matmul %106, %107, %cst_116 {dimension_numbers = #tpu.dot_dimension_numbers<[1], [0], [0], [1], [0, 0, 1, 1], [], []>} : vector<8x8xbf16>, vector<8x100xbf16>, vector<8x100xf32> -> vector<8x100xf32>
    %109 = arith.addf %104, %108 : vector<8x100xf32>
    %c8_117 = arith.constant 8 : index
    %c0_118 = arith.constant 0 : index
    %c0_119 = arith.constant 0 : index
    %110 = vector.load %arg3[%c8_117, %c0_118, %c0_119] : memref<9x8x8xbf16, #tpu.memory_space<vmem>>, vector<1x8x8xbf16>
    %111 = vector.shape_cast %110 : vector<1x8x8xbf16> to vector<8x8xbf16>
    %c0_120 = arith.constant 0 : index
    %c31 = arith.constant 31 : index
    %112 = vector.load %arg9[%c0_120, %c31] : memref<8x140xbf16, #tpu.memory_space<vmem>>, vector<8x100xbf16>
    %cst_121 = arith.constant dense<0.000000e+00> : vector<8x100xf32>
    %113 = tpu.matmul %111, %112, %cst_121 {dimension_numbers = #tpu.dot_dimension_numbers<[1], [0], [0], [1], [0, 0, 1, 1], [], []>} : vector<8x8xbf16>, vector<8x100xbf16>, vector<8x100xf32> -> vector<8x100xf32>
    %114 = arith.addf %109, %113 : vector<8x100xf32>
    %c0_122 = arith.constant 0 : index
    %c3_123 = arith.constant 3 : index
    %c0_124 = arith.constant 0 : index
    %c9_125 = arith.constant 9 : index
    %115 = vector.load %arg1[%c0_122, %c3_123, %c0_124, %c9_125] : memref<2x4x4x140xbf16, #tpu.memory_space<vmem>>, vector<1x1x4x100xbf16>
    %116 = vector.shape_cast %115 : vector<1x1x4x100xbf16> to vector<4x100xbf16>
    %c0_126 = arith.constant 0 : index
    %c0_127 = arith.constant 0 : index
    %117 = vector.load %arg4[%c0_126, %c0_127] : memref<8x4xbf16, #tpu.memory_space<vmem>>, vector<8x4xbf16>
    %cst_128 = arith.constant dense<0.000000e+00> : vector<8x100xf32>
    %118 = tpu.matmul %117, %116, %cst_128 {dimension_numbers = #tpu.dot_dimension_numbers<[1], [0], [0], [1], [0, 0, 1, 1], [], []>} : vector<8x4xbf16>, vector<4x100xbf16>, vector<8x100xf32> -> vector<8x100xf32>
    %119 = arith.addf %114, %118 : vector<8x100xf32>
    %120 = vector.broadcast %5 : vector<8x1xf32> to vector<8x100xf32>
    %121 = arith.addf %119, %120 : vector<8x100xf32>
    %cst_129 = arith.constant 0.000000e+00 : f32
    %122 = vector.broadcast %cst_129 : f32 to vector<8x100xf32>
    %123 = arith.maximumf %121, %122 : vector<8x100xf32>
    %c0_130 = arith.constant 0 : index
    %c0_131 = arith.constant 0 : index
    %c0_132 = arith.constant 0 : index
    %124 = vector.load %arg8[%c0_130, %c0_131, %c0_132] : memref<2x8x100xf32, #tpu.memory_space<vmem>>, vector<1x8x100xf32>
    %125 = vector.shape_cast %124 : vector<1x8x100xf32> to vector<8x100xf32>
    %126 = vector.shape_cast %123 : vector<8x100xf32> to vector<1x8x100xf32>
    tpu.vector_store %arg8[%c0_130, %c0_131, %c0_132], %126 {strides = array<i32>} : memref<2x8x100xf32, #tpu.memory_space<vmem>>, vector<1x8x100xf32>,
    %cst_133 = arith.constant 0.000000e+00 : f32
    %127 = vector.broadcast %cst_133 : f32 to vector<8x100xf32>
    %c1_134 = arith.constant 1 : index
    %c0_135 = arith.constant 0 : index
    %c0_136 = arith.constant 0 : index
    %c9_137 = arith.constant 9 : index
    %128 = vector.load %arg1[%c1_134, %c0_135, %c0_136, %c9_137] : memref<2x4x4x140xbf16, #tpu.memory_space<vmem>>, vector<1x1x4x100xbf16>
    %129 = vector.shape_cast %128 : vector<1x1x4x100xbf16> to vector<4x100xbf16>
    %c0_138 = arith.constant 0 : index
    %c0_139 = arith.constant 0 : index
    %c0_140 = arith.constant 0 : index
    %130 = vector.load %arg2[%c0_138, %c0_139, %c0_140] : memref<9x8x4xbf16, #tpu.memory_space<vmem>>, vector<1x8x4xbf16>
    %131 = vector.shape_cast %130 : vector<1x8x4xbf16> to vector<8x4xbf16>
    %cst_141 = arith.constant dense<0.000000e+00> : vector<8x100xf32>
    %132 = tpu.matmul %131, %129, %cst_141 {dimension_numbers = #tpu.dot_dimension_numbers<[1], [0], [0], [1], [0, 0, 1, 1], [], []>} : vector<8x4xbf16>, vector<4x100xbf16>, vector<8x100xf32> -> vector<8x100xf32>
    %133 = arith.addf %127, %132 : vector<8x100xf32>
    %c1_142 = arith.constant 1 : index
    %c1_143 = arith.constant 1 : index
    %c0_144 = arith.constant 0 : index
    %c9_145 = arith.constant 9 : index
    %134 = vector.load %arg1[%c1_142, %c1_143, %c0_144, %c9_145] : memref<2x4x4x140xbf16, #tpu.memory_space<vmem>>, vector<1x1x4x100xbf16>
    %135 = vector.shape_cast %134 : vector<1x1x4x100xbf16> to vector<4x100xbf16>
    %c1_146 = arith.constant 1 : index
    %c0_147 = arith.constant 0 : index
    %c0_148 = arith.constant 0 : index
    %136 = vector.load %arg2[%c1_146, %c0_147, %c0_148] : memref<9x8x4xbf16, #tpu.memory_space<vmem>>, vector<1x8x4xbf16>
    %137 = vector.shape_cast %136 : vector<1x8x4xbf16> to vector<8x4xbf16>
    %cst_149 = arith.constant dense<0.000000e+00> : vector<8x100xf32>
    %138 = tpu.matmul %137, %135, %cst_149 {dimension_numbers = #tpu.dot_dimension_numbers<[1], [0], [0], [1], [0, 0, 1, 1], [], []>} : vector<8x4xbf16>, vector<4x100xbf16>, vector<8x100xf32> -> vector<8x100xf32>
    %139 = arith.addf %133, %138 : vector<8x100xf32>
    %c1_150 = arith.constant 1 : index
    %c0_151 = arith.constant 0 : index
    %c0_152 = arith.constant 0 : index
    %c10_153 = arith.constant 10 : index
    %140 = vector.load %arg1[%c1_150, %c0_151, %c0_152, %c10_153] : memref<2x4x4x140xbf16, #tpu.memory_space<vmem>>, vector<1x1x4x100xbf16>
    %141 = vector.shape_cast %140 : vector<1x1x4x100xbf16> to vector<4x100xbf16>
    %c2_154 = arith.constant 2 : index
    %c0_155 = arith.constant 0 : index
    %c0_156 = arith.constant 0 : index
    %142 = vector.load %arg2[%c2_154, %c0_155, %c0_156] : memref<9x8x4xbf16, #tpu.memory_space<vmem>>, vector<1x8x4xbf16>
    %143 = vector.shape_cast %142 : vector<1x8x4xbf16> to vector<8x4xbf16>
    %cst_157 = arith.constant dense<0.000000e+00> : vector<8x100xf32>
    %144 = tpu.matmul %143, %141, %cst_157 {dimension_numbers = #tpu.dot_dimension_numbers<[1], [0], [0], [1], [0, 0, 1, 1], [], []>} : vector<8x4xbf16>, vector<4x100xbf16>, vector<8x100xf32> -> vector<8x100xf32>
    %145 = arith.addf %139, %144 : vector<8x100xf32>
    %c1_158 = arith.constant 1 : index
    %c2_159 = arith.constant 2 : index
    %c0_160 = arith.constant 0 : index
    %c9_161 = arith.constant 9 : index
    %146 = vector.load %arg1[%c1_158, %c2_159, %c0_160, %c9_161] : memref<2x4x4x140xbf16, #tpu.memory_space<vmem>>, vector<1x1x4x100xbf16>
    %147 = vector.shape_cast %146 : vector<1x1x4x100xbf16> to vector<4x100xbf16>
    %c3_162 = arith.constant 3 : index
    %c0_163 = arith.constant 0 : index
    %c0_164 = arith.constant 0 : index
    %148 = vector.load %arg2[%c3_162, %c0_163, %c0_164] : memref<9x8x4xbf16, #tpu.memory_space<vmem>>, vector<1x8x4xbf16>
    %149 = vector.shape_cast %148 : vector<1x8x4xbf16> to vector<8x4xbf16>
    %cst_165 = arith.constant dense<0.000000e+00> : vector<8x100xf32>
    %150 = tpu.matmul %149, %147, %cst_165 {dimension_numbers = #tpu.dot_dimension_numbers<[1], [0], [0], [1], [0, 0, 1, 1], [], []>} : vector<8x4xbf16>, vector<4x100xbf16>, vector<8x100xf32> -> vector<8x100xf32>
    %151 = arith.addf %145, %150 : vector<8x100xf32>
    %c1_166 = arith.constant 1 : index
    %c3_167 = arith.constant 3 : index
    %c0_168 = arith.constant 0 : index
    %c9_169 = arith.constant 9 : index
    %152 = vector.load %arg1[%c1_166, %c3_167, %c0_168, %c9_169] : memref<2x4x4x140xbf16, #tpu.memory_space<vmem>>, vector<1x1x4x100xbf16>
    %153 = vector.shape_cast %152 : vector<1x1x4x100xbf16> to vector<4x100xbf16>
    %c4_170 = arith.constant 4 : index
    %c0_171 = arith.constant 0 : index
    %c0_172 = arith.constant 0 : index
    %154 = vector.load %arg2[%c4_170, %c0_171, %c0_172] : memref<9x8x4xbf16, #tpu.memory_space<vmem>>, vector<1x8x4xbf16>
    %155 = vector.shape_cast %154 : vector<1x8x4xbf16> to vector<8x4xbf16>
    %cst_173 = arith.constant dense<0.000000e+00> : vector<8x100xf32>
    %156 = tpu.matmul %155, %153, %cst_173 {dimension_numbers = #tpu.dot_dimension_numbers<[1], [0], [0], [1], [0, 0, 1, 1], [], []>} : vector<8x4xbf16>, vector<4x100xbf16>, vector<8x100xf32> -> vector<8x100xf32>
    %157 = arith.addf %151, %156 : vector<8x100xf32>
    %c1_174 = arith.constant 1 : index
    %c2_175 = arith.constant 2 : index
    %c0_176 = arith.constant 0 : index
    %c10_177 = arith.constant 10 : index
    %158 = vector.load %arg1[%c1_174, %c2_175, %c0_176, %c10_177] : memref<2x4x4x140xbf16, #tpu.memory_space<vmem>>, vector<1x1x4x100xbf16>
    %159 = vector.shape_cast %158 : vector<1x1x4x100xbf16> to vector<4x100xbf16>
    %c5_178 = arith.constant 5 : index
    %c0_179 = arith.constant 0 : index
    %c0_180 = arith.constant 0 : index
    %160 = vector.load %arg2[%c5_178, %c0_179, %c0_180] : memref<9x8x4xbf16, #tpu.memory_space<vmem>>, vector<1x8x4xbf16>
    %161 = vector.shape_cast %160 : vector<1x8x4xbf16> to vector<8x4xbf16>
    %cst_181 = arith.constant dense<0.000000e+00> : vector<8x100xf32>
    %162 = tpu.matmul %161, %159, %cst_181 {dimension_numbers = #tpu.dot_dimension_numbers<[1], [0], [0], [1], [0, 0, 1, 1], [], []>} : vector<8x4xbf16>, vector<4x100xbf16>, vector<8x100xf32> -> vector<8x100xf32>
    %163 = arith.addf %157, %162 : vector<8x100xf32>
    %c1_182 = arith.constant 1 : index
    %c0_183 = arith.constant 0 : index
    %c0_184 = arith.constant 0 : index
    %c19_185 = arith.constant 19 : index
    %164 = vector.load %arg1[%c1_182, %c0_183, %c0_184, %c19_185] : memref<2x4x4x140xbf16, #tpu.memory_space<vmem>>, vector<1x1x4x100xbf16>
    %165 = vector.shape_cast %164 : vector<1x1x4x100xbf16> to vector<4x100xbf16>
    %c6_186 = arith.constant 6 : index
    %c0_187 = arith.constant 0 : index
    %c0_188 = arith.constant 0 : index
    %166 = vector.load %arg2[%c6_186, %c0_187, %c0_188] : memref<9x8x4xbf16, #tpu.memory_space<vmem>>, vector<1x8x4xbf16>
    %167 = vector.shape_cast %166 : vector<1x8x4xbf16> to vector<8x4xbf16>
    %cst_189 = arith.constant dense<0.000000e+00> : vector<8x100xf32>
    %168 = tpu.matmul %167, %165, %cst_189 {dimension_numbers = #tpu.dot_dimension_numbers<[1], [0], [0], [1], [0, 0, 1, 1], [], []>} : vector<8x4xbf16>, vector<4x100xbf16>, vector<8x100xf32> -> vector<8x100xf32>
    %169 = arith.addf %163, %168 : vector<8x100xf32>
    %c1_190 = arith.constant 1 : index
    %c1_191 = arith.constant 1 : index
    %c0_192 = arith.constant 0 : index
    %c19_193 = arith.constant 19 : index
    %170 = vector.load %arg1[%c1_190, %c1_191, %c0_192, %c19_193] : memref<2x4x4x140xbf16, #tpu.memory_space<vmem>>, vector<1x1x4x100xbf16>
    %171 = vector.shape_cast %170 : vector<1x1x4x100xbf16> to vector<4x100xbf16>
    %c7_194 = arith.constant 7 : index
    %c0_195 = arith.constant 0 : index
    %c0_196 = arith.constant 0 : index
    %172 = vector.load %arg2[%c7_194, %c0_195, %c0_196] : memref<9x8x4xbf16, #tpu.memory_space<vmem>>, vector<1x8x4xbf16>
    %173 = vector.shape_cast %172 : vector<1x8x4xbf16> to vector<8x4xbf16>
    %cst_197 = arith.constant dense<0.000000e+00> : vector<8x100xf32>
    %174 = tpu.matmul %173, %171, %cst_197 {dimension_numbers = #tpu.dot_dimension_numbers<[1], [0], [0], [1], [0, 0, 1, 1], [], []>} : vector<8x4xbf16>, vector<4x100xbf16>, vector<8x100xf32> -> vector<8x100xf32>
    %175 = arith.addf %169, %174 : vector<8x100xf32>
    %c1_198 = arith.constant 1 : index
    %c0_199 = arith.constant 0 : index
    %c0_200 = arith.constant 0 : index
    %c20_201 = arith.constant 20 : index
    %176 = vector.load %arg1[%c1_198, %c0_199, %c0_200, %c20_201] : memref<2x4x4x140xbf16, #tpu.memory_space<vmem>>, vector<1x1x4x100xbf16>
    %177 = vector.shape_cast %176 : vector<1x1x4x100xbf16> to vector<4x100xbf16>
    %c8_202 = arith.constant 8 : index
    %c0_203 = arith.constant 0 : index
    %c0_204 = arith.constant 0 : index
    %178 = vector.load %arg2[%c8_202, %c0_203, %c0_204] : memref<9x8x4xbf16, #tpu.memory_space<vmem>>, vector<1x8x4xbf16>
    %179 = vector.shape_cast %178 : vector<1x8x4xbf16> to vector<8x4xbf16>
    %cst_205 = arith.constant dense<0.000000e+00> : vector<8x100xf32>
    %180 = tpu.matmul %179, %177, %cst_205 {dimension_numbers = #tpu.dot_dimension_numbers<[1], [0], [0], [1], [0, 0, 1, 1], [], []>} : vector<8x4xbf16>, vector<4x100xbf16>, vector<8x100xf32> -> vector<8x100xf32>
    %181 = arith.addf %175, %180 : vector<8x100xf32>
    %182 = vector.broadcast %4 : vector<8x1xf32> to vector<8x100xf32>
    %183 = arith.addf %181, %182 : vector<8x100xf32>
    %cst_206 = arith.constant 0.000000e+00 : f32
    %184 = vector.broadcast %cst_206 : f32 to vector<8x100xf32>
    %185 = arith.maximumf %183, %184 : vector<8x100xf32>
    %186 = vector.broadcast %3 : vector<1x100xf32> to vector<8x100xf32>
    %187 = arith.mulf %185, %186 : vector<8x100xf32>
    %188 = arith.truncf %187 : vector<8x100xf32> to vector<8x100xbf16>
    %c0_207 = arith.constant 0 : index
    %c20_208 = arith.constant 20 : index
    %189 = vector.load %arg9[%c0_207, %c20_208] : memref<8x140xbf16, #tpu.memory_space<vmem>>, vector<8x100xbf16>
    tpu.vector_store %arg9[%c0_207, %c20_208], %188 {strides = array<i32>} : memref<8x140xbf16, #tpu.memory_space<vmem>>, vector<8x100xbf16>,
    %cst_209 = arith.constant 0.000000e+00 : f32
    %190 = vector.broadcast %cst_209 : f32 to vector<8x100xf32>
    %c0_210 = arith.constant 0 : index
    %c0_211 = arith.constant 0 : index
    %c0_212 = arith.constant 0 : index
    %191 = vector.load %arg3[%c0_210, %c0_211, %c0_212] : memref<9x8x8xbf16, #tpu.memory_space<vmem>>, vector<1x8x8xbf16>
    %192 = vector.shape_cast %191 : vector<1x8x8xbf16> to vector<8x8xbf16>
    %c0_213 = arith.constant 0 : index
    %c9_214 = arith.constant 9 : index
    %193 = vector.load %arg9[%c0_213, %c9_214] : memref<8x140xbf16, #tpu.memory_space<vmem>>, vector<8x100xbf16>
    %cst_215 = arith.constant dense<0.000000e+00> : vector<8x100xf32>
    %194 = tpu.matmul %192, %193, %cst_215 {dimension_numbers = #tpu.dot_dimension_numbers<[1], [0], [0], [1], [0, 0, 1, 1], [], []>} : vector<8x8xbf16>, vector<8x100xbf16>, vector<8x100xf32> -> vector<8x100xf32>
    %195 = arith.addf %190, %194 : vector<8x100xf32>
    %c1_216 = arith.constant 1 : index
    %c0_217 = arith.constant 0 : index
    %c0_218 = arith.constant 0 : index
    %196 = vector.load %arg3[%c1_216, %c0_217, %c0_218] : memref<9x8x8xbf16, #tpu.memory_space<vmem>>, vector<1x8x8xbf16>
    %197 = vector.shape_cast %196 : vector<1x8x8xbf16> to vector<8x8xbf16>
    %c0_219 = arith.constant 0 : index
    %c10_220 = arith.constant 10 : index
    %198 = vector.load %arg9[%c0_219, %c10_220] : memref<8x140xbf16, #tpu.memory_space<vmem>>, vector<8x100xbf16>
    %cst_221 = arith.constant dense<0.000000e+00> : vector<8x100xf32>
    %199 = tpu.matmul %197, %198, %cst_221 {dimension_numbers = #tpu.dot_dimension_numbers<[1], [0], [0], [1], [0, 0, 1, 1], [], []>} : vector<8x8xbf16>, vector<8x100xbf16>, vector<8x100xf32> -> vector<8x100xf32>
    %200 = arith.addf %195, %199 : vector<8x100xf32>
    %c2_222 = arith.constant 2 : index
    %c0_223 = arith.constant 0 : index
    %c0_224 = arith.constant 0 : index
    %201 = vector.load %arg3[%c2_222, %c0_223, %c0_224] : memref<9x8x8xbf16, #tpu.memory_space<vmem>>, vector<1x8x8xbf16>
    %202 = vector.shape_cast %201 : vector<1x8x8xbf16> to vector<8x8xbf16>
    %c0_225 = arith.constant 0 : index
    %c11_226 = arith.constant 11 : index
    %203 = vector.load %arg9[%c0_225, %c11_226] : memref<8x140xbf16, #tpu.memory_space<vmem>>, vector<8x100xbf16>
    %cst_227 = arith.constant dense<0.000000e+00> : vector<8x100xf32>
    %204 = tpu.matmul %202, %203, %cst_227 {dimension_numbers = #tpu.dot_dimension_numbers<[1], [0], [0], [1], [0, 0, 1, 1], [], []>} : vector<8x8xbf16>, vector<8x100xbf16>, vector<8x100xf32> -> vector<8x100xf32>
    %205 = arith.addf %200, %204 : vector<8x100xf32>
    %c3_228 = arith.constant 3 : index
    %c0_229 = arith.constant 0 : index
    %c0_230 = arith.constant 0 : index
    %206 = vector.load %arg3[%c3_228, %c0_229, %c0_230] : memref<9x8x8xbf16, #tpu.memory_space<vmem>>, vector<1x8x8xbf16>
    %207 = vector.shape_cast %206 : vector<1x8x8xbf16> to vector<8x8xbf16>
    %c0_231 = arith.constant 0 : index
    %c19_232 = arith.constant 19 : index
    %208 = vector.load %arg9[%c0_231, %c19_232] : memref<8x140xbf16, #tpu.memory_space<vmem>>, vector<8x100xbf16>
    %cst_233 = arith.constant dense<0.000000e+00> : vector<8x100xf32>
    %209 = tpu.matmul %207, %208, %cst_233 {dimension_numbers = #tpu.dot_dimension_numbers<[1], [0], [0], [1], [0, 0, 1, 1], [], []>} : vector<8x8xbf16>, vector<8x100xbf16>, vector<8x100xf32> -> vector<8x100xf32>
    %210 = arith.addf %205, %209 : vector<8x100xf32>
    %c4_234 = arith.constant 4 : index
    %c0_235 = arith.constant 0 : index
    %c0_236 = arith.constant 0 : index
    %211 = vector.load %arg3[%c4_234, %c0_235, %c0_236] : memref<9x8x8xbf16, #tpu.memory_space<vmem>>, vector<1x8x8xbf16>
    %212 = vector.shape_cast %211 : vector<1x8x8xbf16> to vector<8x8xbf16>
    %c0_237 = arith.constant 0 : index
    %c20_238 = arith.constant 20 : index
    %213 = vector.load %arg9[%c0_237, %c20_238] : memref<8x140xbf16, #tpu.memory_space<vmem>>, vector<8x100xbf16>
    %cst_239 = arith.constant dense<0.000000e+00> : vector<8x100xf32>
    %214 = tpu.matmul %212, %213, %cst_239 {dimension_numbers = #tpu.dot_dimension_numbers<[1], [0], [0], [1], [0, 0, 1, 1], [], []>} : vector<8x8xbf16>, vector<8x100xbf16>, vector<8x100xf32> -> vector<8x100xf32>
    %215 = arith.addf %210, %214 : vector<8x100xf32>
    %c5_240 = arith.constant 5 : index
    %c0_241 = arith.constant 0 : index
    %c0_242 = arith.constant 0 : index
    %216 = vector.load %arg3[%c5_240, %c0_241, %c0_242] : memref<9x8x8xbf16, #tpu.memory_space<vmem>>, vector<1x8x8xbf16>
    %217 = vector.shape_cast %216 : vector<1x8x8xbf16> to vector<8x8xbf16>
    %c0_243 = arith.constant 0 : index
    %c21_244 = arith.constant 21 : index
    %218 = vector.load %arg9[%c0_243, %c21_244] : memref<8x140xbf16, #tpu.memory_space<vmem>>, vector<8x100xbf16>
    %cst_245 = arith.constant dense<0.000000e+00> : vector<8x100xf32>
    %219 = tpu.matmul %217, %218, %cst_245 {dimension_numbers = #tpu.dot_dimension_numbers<[1], [0], [0], [1], [0, 0, 1, 1], [], []>} : vector<8x8xbf16>, vector<8x100xbf16>, vector<8x100xf32> -> vector<8x100xf32>
    %220 = arith.addf %215, %219 : vector<8x100xf32>
    %c6_246 = arith.constant 6 : index
    %c0_247 = arith.constant 0 : index
    %c0_248 = arith.constant 0 : index
    %221 = vector.load %arg3[%c6_246, %c0_247, %c0_248] : memref<9x8x8xbf16, #tpu.memory_space<vmem>>, vector<1x8x8xbf16>
    %222 = vector.shape_cast %221 : vector<1x8x8xbf16> to vector<8x8xbf16>
    %c0_249 = arith.constant 0 : index
    %c29_250 = arith.constant 29 : index
    %223 = vector.load %arg9[%c0_249, %c29_250] : memref<8x140xbf16, #tpu.memory_space<vmem>>, vector<8x100xbf16>
    %cst_251 = arith.constant dense<0.000000e+00> : vector<8x100xf32>
    %224 = tpu.matmul %222, %223, %cst_251 {dimension_numbers = #tpu.dot_dimension_numbers<[1], [0], [0], [1], [0, 0, 1, 1], [], []>} : vector<8x8xbf16>, vector<8x100xbf16>, vector<8x100xf32> -> vector<8x100xf32>
    %225 = arith.addf %220, %224 : vector<8x100xf32>
    %c7_252 = arith.constant 7 : index
    %c0_253 = arith.constant 0 : index
    %c0_254 = arith.constant 0 : index
    %226 = vector.load %arg3[%c7_252, %c0_253, %c0_254] : memref<9x8x8xbf16, #tpu.memory_space<vmem>>, vector<1x8x8xbf16>
    %227 = vector.shape_cast %226 : vector<1x8x8xbf16> to vector<8x8xbf16>
    %c0_255 = arith.constant 0 : index
    %c30_256 = arith.constant 30 : index
    %228 = vector.load %arg9[%c0_255, %c30_256] : memref<8x140xbf16, #tpu.memory_space<vmem>>, vector<8x100xbf16>
    %cst_257 = arith.constant dense<0.000000e+00> : vector<8x100xf32>
    %229 = tpu.matmul %227, %228, %cst_257 {dimension_numbers = #tpu.dot_dimension_numbers<[1], [0], [0], [1], [0, 0, 1, 1], [], []>} : vector<8x8xbf16>, vector<8x100xbf16>, vector<8x100xf32> -> vector<8x100xf32>
    %230 = arith.addf %225, %229 : vector<8x100xf32>
    %c8_258 = arith.constant 8 : index
    %c0_259 = arith.constant 0 : index
    %c0_260 = arith.constant 0 : index
    %231 = vector.load %arg3[%c8_258, %c0_259, %c0_260] : memref<9x8x8xbf16, #tpu.memory_space<vmem>>, vector<1x8x8xbf16>
    %232 = vector.shape_cast %231 : vector<1x8x8xbf16> to vector<8x8xbf16>
    %c0_261 = arith.constant 0 : index
    %c31_262 = arith.constant 31 : index
    %233 = vector.load %arg9[%c0_261, %c31_262] : memref<8x140xbf16, #tpu.memory_space<vmem>>, vector<8x100xbf16>
    %cst_263 = arith.constant dense<0.000000e+00> : vector<8x100xf32>
    %234 = tpu.matmul %232, %233, %cst_263 {dimension_numbers = #tpu.dot_dimension_numbers<[1], [0], [0], [1], [0, 0, 1, 1], [], []>} : vector<8x8xbf16>, vector<8x100xbf16>, vector<8x100xf32> -> vector<8x100xf32>
    %235 = arith.addf %230, %234 : vector<8x100xf32>
    %c1_264 = arith.constant 1 : index
    %c3_265 = arith.constant 3 : index
    %c0_266 = arith.constant 0 : index
    %c9_267 = arith.constant 9 : index
    %236 = vector.load %arg1[%c1_264, %c3_265, %c0_266, %c9_267] : memref<2x4x4x140xbf16, #tpu.memory_space<vmem>>, vector<1x1x4x100xbf16>
    %237 = vector.shape_cast %236 : vector<1x1x4x100xbf16> to vector<4x100xbf16>
    %c0_268 = arith.constant 0 : index
    %c0_269 = arith.constant 0 : index
    %238 = vector.load %arg4[%c0_268, %c0_269] : memref<8x4xbf16, #tpu.memory_space<vmem>>, vector<8x4xbf16>
    %cst_270 = arith.constant dense<0.000000e+00> : vector<8x100xf32>
    %239 = tpu.matmul %238, %237, %cst_270 {dimension_numbers = #tpu.dot_dimension_numbers<[1], [0], [0], [1], [0, 0, 1, 1], [], []>} : vector<8x4xbf16>, vector<4x100xbf16>, vector<8x100xf32> -> vector<8x100xf32>
    %240 = arith.addf %235, %239 : vector<8x100xf32>
    %241 = vector.broadcast %5 : vector<8x1xf32> to vector<8x100xf32>
    %242 = arith.addf %240, %241 : vector<8x100xf32>
    %cst_271 = arith.constant 0.000000e+00 : f32
    %243 = vector.broadcast %cst_271 : f32 to vector<8x100xf32>
    %244 = arith.maximumf %242, %243 : vector<8x100xf32>
    %c1_272 = arith.constant 1 : index
    %c0_273 = arith.constant 0 : index
    %c0_274 = arith.constant 0 : index
    %245 = vector.load %arg8[%c1_272, %c0_273, %c0_274] : memref<2x8x100xf32, #tpu.memory_space<vmem>>, vector<1x8x100xf32>
    %246 = vector.shape_cast %245 : vector<1x8x100xf32> to vector<8x100xf32>
    %247 = vector.shape_cast %244 : vector<8x100xf32> to vector<1x8x100xf32>
    tpu.vector_store %arg8[%c1_272, %c0_273, %c0_274], %247 {strides = array<i32>} : memref<2x8x100xf32, #tpu.memory_space<vmem>>, vector<1x8x100xf32>,
    return
  }
  func.func @transform_0(%arg0: i32) -> (i32, i32, i32, i32) {
    %c0_i32 = arith.constant 0 : i32
    %c0_i32_0 = arith.constant 0 : i32
    %c0_i32_1 = arith.constant 0 : i32
    %c0_i32_2 = arith.constant 0 : i32
    return %arg0, %c0_i32, %c0_i32_0, %c0_i32_1 : i32, i32, i32, i32
  }
  func.func @transform_1(%arg0: i32) -> (i32, i32, i32) {
    %c0_i32 = arith.constant 0 : i32
    %c0_i32_0 = arith.constant 0 : i32
    %c0_i32_1 = arith.constant 0 : i32
    %c0_i32_2 = arith.constant 0 : i32
    return %c0_i32, %c0_i32_0, %c0_i32_1 : i32, i32, i32
  }
  func.func @transform_2(%arg0: i32) -> (i32, i32, i32) {
    %c0_i32 = arith.constant 0 : i32
    %c0_i32_0 = arith.constant 0 : i32
    %c0_i32_1 = arith.constant 0 : i32
    %c0_i32_2 = arith.constant 0 : i32
    return %c0_i32, %c0_i32_0, %c0_i32_1 : i32, i32, i32
  }
  func.func @transform_3(%arg0: i32) -> (i32, i32) {
    %c0_i32 = arith.constant 0 : i32
    %c0_i32_0 = arith.constant 0 : i32
    %c0_i32_1 = arith.constant 0 : i32
    return %c0_i32, %c0_i32_0 : i32, i32
  }
  func.func @transform_4(%arg0: i32) -> (i32, i32) {
    %c0_i32 = arith.constant 0 : i32
    %c0_i32_0 = arith.constant 0 : i32
    %c0_i32_1 = arith.constant 0 : i32
    return %c0_i32, %c0_i32_0 : i32, i32
  }
  func.func @transform_5(%arg0: i32) -> (i32, i32) {
    %c0_i32 = arith.constant 0 : i32
    %c0_i32_0 = arith.constant 0 : i32
    %c0_i32_1 = arith.constant 0 : i32
    return %c0_i32, %c0_i32_0 : i32, i32
  }
  func.func @transform_6(%arg0: i32) -> (i32, i32) {
    %c0_i32 = arith.constant 0 : i32
    %c0_i32_0 = arith.constant 0 : i32
    %c0_i32_1 = arith.constant 0 : i32
    return %c0_i32, %c0_i32_0 : i32, i32
  }
  func.func @transform_7(%arg0: i32) -> (i32, i32, i32) {
    %c0_i32 = arith.constant 0 : i32
    %c0_i32_0 = arith.constant 0 : i32
    %c0_i32_1 = arith.constant 0 : i32
    return %arg0, %c0_i32, %c0_i32_0 : i32, i32, i32
  }
}

</mosaic_0001>

<bundles_post_ra>
// kernel: residual_block_forward.1
= control target key start
LH: loop header
LB: loop body
LE: loop exit
PB: predicated region body
PF: predicated region fallthrough
CT: control target
= control target key end

     0   :  { %v2670_v1 = vmov 0.0   ;;  %vm2671_vm0 = vmmov 0   ;;  %s2672_s26 = smov 119   ;;  %s2673_s29 = smov 118   ;;  %v2676_v5 = vmov 0   ;;  %vm56_vm1 = vcmask 1041408   ;;  %s3145_s0 = inlined_call_operand.vmem [shape: bf16[2,4,4,140], index: 0, kind: input, shape index: {}]   ;;  %s3146_s4 = inlined_call_operand.vmem [shape: f32[8,1], index: 4, kind: input, shape index: {}]   ;;  %s3147_s1 = inlined_call_operand.vmem [shape: bf16[9,8,4], index: 1, kind: input, shape index: {}]   ;;  %s3148_s6 = inlined_call_operand.vmem [shape: f32[1,100], index: 6, kind: input, shape index: {}]   ;;  %s3149_s2 = inlined_call_operand.vmem [shape: bf16[9,8,8], index: 2, kind: input, shape index: {}]   ;;  %s3150_s3 = inlined_call_operand.vmem [shape: bf16[8,4], index: 3, kind: input, shape index: {}]   ;;  %s3151_s5 = inlined_call_operand.vmem [shape: f32[8,1], index: 5, kind: input, shape index: {}]   ;;  %s3152_s7 = inlined_call_operand.vmem [shape: f32[2,8,100], index: 7, kind: output, shape index: {}]  }
   0x1   :  { %v2229_v0 = vld.sshfl [vmem:[%s3145_s0 + $0x4] sm:$0x3 pattern:$0x76325410]  ;;  %2421 = vmatprep.subr.bf16.mxu0 %v2670_v1  ;;  %2423 = vmatprep.mubr.msk.bf16.mxu0 %vm2671_vm0, %v2670_v1  ;;  %s2674_s11 = smov 109   ;;  %s2675_s12 = smov 108  }
   0x2   :  { %50 = vrot.lane.b32.xlu0 %v2229_v0, %s2672_s26  ;;  %v2231_v2 = vld.sshfl [vmem:[%s3145_s0] sm:$0x3 pattern:$0x76325410]  ;;  %2427 = vmatprep.subr.bf16.mxu1 %v2670_v1  ;;  %v2228_v10 = vld [vmem:[%s3147_s1 + $0x4] sm:$0xf] }
   0x3   :  { %167 = vrot.lane.b32.xlu1 %v2231_v2, %s2673_s29  ;;  %2429 = vmatprep.mubr.msk.bf16.mxu1 %vm2671_vm0, %v2670_v1  ;;  %v2238_v3 = vld.sshfl [vmem:[%s3145_s0 + $0x8] sm:$0x3 pattern:$0x76325410]  ;;  %v34_v6 = vld [vmem:[%s3146_s4] sm:$0xff]  ;;  %vm52_vm2 = vcmask 31744  }
   0x4   :  { %v2745_v4 = vld.sshfl [vmem:[%s3145_s0 + $0xc] sm:$0x3 pattern:$0x76325410]  ;;  %2662 = vset.pattern.permute.xlu1 %v2676_v5  ;;  %2663 = vset.pattern.permute.xlu0 %v2676_v5  ;;  %v37_v15 = vld [vmem:[%s3147_s1] sm:$0xf] }
   0x5   :  { %v2233_v18 = vld [vmem:[%s3147_s1 + $0x8] sm:$0xf]  ;;  %v2237_v21 = vld [vmem:[%s3147_s1 + $0xc] sm:$0xf]  ;;  %v2241_v24 = vld [vmem:[%s3147_s1 + $0x10] sm:$0xf] }
   0x6   :  { %108 = vrot.lane.b32.xlu0 %v2231_v2, %s2672_s26  ;;  %v2245_v27 = vld [vmem:[%s3147_s1 + $0x14] sm:$0xf]  ;;  %v2248_v30 = vld [vmem:[%s3147_s1 + $0x18] sm:$0xf]  ;;  %v2252_v32 = vld [vmem:[%s3147_s1 + $0x1c] sm:$0xf] }
   0x7   :  { %228 = vrot.lane.b32.xlu1 %v2238_v3, %s2672_s26  ;;  %v2255_v33 = vld [vmem:[%s3147_s1 + $0x20] sm:$0xf]  ;;  %vm27_vm3 = vcmask 158720   ;;  %vm29_vm4 = vcmask 1044416   ;;  %vm30_vm5 = vcmask 97284   ;;  %s2677_s15 = smov 20  }
   0x8   :  { %28 = vst.msk [vmem:[#allocation2] sm:$0xf] %vm27_vm3, %v2676_v5  ;;  %vm31_vm6 = vmor %vm30_vm5, %vm29_vm4  ;;  %vm599_vm7 = vcmask 978080   ;;  %s2679_s16 = smov 107   ;;  %s2680_s4 = smov 99   ;;  %vm614_vm8 = vcmask 1043456  }
   0x9   :  { %32 = vst.msk [vmem:[#allocation2] sm:$0xff] %vm31_vm6, %v2676_v5  ;;  %s2681_s17 = smov 98   ;;  %s2682_s18 = smov 97   ;;  %vm610_vm9 = vcmask 64512   ;;  %vm922_vm10 = vcmask 809984   ;;  %vm977_vm11 = vcmask 801792  }
   0xa   :  { %289 = vrot.lane.b32.xlu0 %v2745_v4, %s2672_s26  ;;  %vm1032_vm12 = vcmask 793600   ;;  %vm1147_vm13 = vcmask 818176  }
   0xb   :  { %349 = vrot.lane.b32.xlu1 %v2238_v3, %s2673_s29 }
   0xe   :  { %409 = vrot.lane.b32.xlu0 %v2231_v2, %s2674_s11 }
   0xf   :  { %469 = vrot.lane.b32.xlu1 %v2229_v0, %s2674_s11 }
  0x12   :  { %529 = vrot.lane.b32.xlu0 %v2231_v2, %s2675_s12 }
  0x13   :  { %580 = vperm.xlu1 %2662, %v34_v6  }
  0x74   :  { %v51_v7 = vpop.permute.xlu0 %50 }
  0x75   :  { %v58_v8 = vsel %vm56_vm1, %v51_v7, 0  ;;  %v168_v9 = vpop.permute.xlu1 %167 }
  0x76   :  { %2422 = vmatpush3.bf16.msra.mxu0 %v58_v8  ;;  %v173_v11 = vsel %vm56_vm1, %v168_v9, 0 }
  0x77   :  { %2433 = vmatprep.subr.bf16.mxu0 %v2670_v1 }
  0x78   :  { %v109_v12 = vpop.permute.xlu0 %108 }
  0x79   :  { %2424 = vmatmul.mubr.msk.bf16.vlgmr.msra.gmra.mrb[0].mxu0 %vm52_vm2, %v2228_v10  ;;  %v114_v13 = vsel %vm56_vm1, %v109_v12, 0  ;;  %v229_v14 = vpop.permute.xlu1 %228 }
  0x7a   :  { %2428 = vmatpush3.bf16.msra.mxu1 %v114_v13  ;;  %2434 = vmatpush3.bf16.msra.mxu0 %v173_v11  ;;  %v234_v16 = vsel %vm56_vm1, %v229_v14, 0 }
  0x7b   :  { %2435 = vmatprep.mubr.msk.bf16.mxu0 %vm2671_vm0, %v2670_v1  ;;  %2439 = vmatprep.subr.bf16.mxu1 %v2670_v1 }
  0x7c   :  { %v290_v17 = vpop.permute.xlu0 %289  ;;  %2445 = vmatprep.subr.bf16.mxu0 %v2670_v1 }
  0x7d   :  { %2430 = vmatmul.mubr.msk.bf16.vlgmr.msra.gmra.mrb[0].mxu1 %vm52_vm2, %v37_v15  ;;  %v295_v19 = vsel %vm56_vm1, %v290_v17, 0  ;;  %v350_v20 = vpop.permute.xlu1 %349 }
  0x7e   :  { %2440 = vmatpush3.bf16.msra.mxu1 %v234_v16  ;;  %2441 = vmatprep.mubr.msk.bf16.mxu1 %vm2671_vm0, %v2670_v1  ;;  %v355_v22 = vsel %vm56_vm1, %v350_v20, 0 }
  0x7f   :  { %2451 = vmatprep.subr.bf16.mxu1 %v2670_v1 }
  0x80   :  { %v410_v23 = vpop.permute.xlu0 %409 }
  0x81   :  { %2436 = vmatmul.mubr.msk.bf16.vlgmr.msra.gmra.mrb[4].mxu0 %vm52_vm2, %v2233_v18  ;;  %v415_v25 = vsel %vm56_vm1, %v410_v23, 0  ;;  %v470_v26 = vpop.permute.xlu1 %469  ;;  %v2838_v18 = vld [vmem:[%s3148_s6] ss:$0 sm:$0xff]  ;;  %s2678_s6 = smov 117  }
  0x82   :  { %2446 = vmatpush3.bf16.msra.mxu0 %v295_v19  ;;  %2447 = vmatprep.mubr.msk.bf16.mxu0 %vm2671_vm0, %v2670_v1  ;;  %v475_v28 = vsel %vm56_vm1, %v470_v26, 0 }
  0x83   :  { %2457 = vmatprep.subr.bf16.mxu0 %v2670_v1 }
  0x84   :  { %v530_v29 = vpop.permute.xlu0 %529 }
  0x85   :  { %2442 = vmatmul.mubr.msk.bf16.vlgmr.msra.gmra.mrb[4].mxu1 %vm52_vm2, %v2237_v21  ;;  %v535_v31 = vsel %vm56_vm1, %v530_v29, 0  ;;  %v2296_v29 = vld.sshfl [vmem:[%s3145_s0 + $0x18] sm:$0x3 pattern:$0x76325410] }
  0x86   :  { %2452 = vmatpush3.bf16.msra.mxu1 %v355_v22  ;;  %2453 = vmatprep.mubr.msk.bf16.mxu1 %vm2671_vm0, %v2670_v1 }
  0x87   :  { %2463 = vmatprep.subr.bf16.mxu1 %v2670_v1 }
  0x89   :  { %2448 = vmatmul.mubr.msk.bf16.vlgmr.msra.gmra.mrb[8].mxu0 %vm52_vm2, %v2241_v24 }
  0x8a   :  { %2458 = vmatpush3.bf16.msra.mxu0 %v415_v25  ;;  %2459 = vmatprep.mubr.msk.bf16.mxu0 %vm2671_vm0, %v2670_v1 }
  0x8b   :  { %2469 = vmatprep.subr.bf16.mxu0 %v2670_v1 }
  0x8d   :  { %2454 = vmatmul.mubr.msk.bf16.vlgmr.msra.gmra.mrb[8].mxu1 %vm52_vm2, %v2245_v27  ;;  %v2286_v27 = vld.sshfl [vmem:[%s3145_s0 + $0x14] sm:$0x3 pattern:$0x76325410] }
  0x8e   :  { %2464 = vmatpush3.bf16.msra.mxu1 %v475_v28  ;;  %2465 = vmatprep.mubr.msk.bf16.mxu1 %vm2671_vm0, %v2670_v1  ;;  %v2288_v28 = vld.sshfl [vmem:[%s3145_s0 + $0x10] sm:$0x3 pattern:$0x76325410] }
  0x8f   :  { %2475 = vmatprep.subr.bf16.mxu1 %v2670_v1 }
  0x91   :  { %2460 = vmatmul.mubr.msk.bf16.vlgmr.msra.gmra.mrb[12].mxu0 %vm52_vm2, %v2248_v30  ;;  %v2872_v30 = vld.sshfl [vmem:[%s3145_s0 + $0x1c] sm:$0x3 pattern:$0x76325410] }
  0x92   :  { %2470 = vmatpush3.bf16.msra.mxu0 %v535_v31  ;;  %2471 = vmatprep.mubr.msk.bf16.mxu0 %vm2671_vm0, %v2670_v1  ;;  %v2832_v12 = vpop.permute.xlu1 %580 }
  0x93   :  { %2481 = vmatprep.subr.bf16.mxu0 %v2670_v1 }
  0x95   :  { %2466 = vmatmul.mubr.msk.bf16.vlgmr.msra.gmra.mrb[12].mxu1 %vm52_vm2, %v2252_v32 }
  0x96   :  { %2477 = vmatprep.mubr.msk.bf16.mxu1 %vm2671_vm0, %v2670_v1 }
  0x99   :  { %2472 = vmatmul.mubr.msk.bf16.vlgmr.msra.gmra.mrb[16].mxu0 %vm52_vm2, %v2255_v33 }
  0x9a   :  { %2483 = vmatprep.mubr.msk.bf16.mxu0 %vm2671_vm0, %v2670_v1 }
 0x14c   :  { %v94_v34 = vpop.f32.mrb[0].mxu0 }
 0x14d   :  { %v2425_v35 = vpop.f32.mrb[1].mxu0 }
 0x14e   :  { %v97_v36 = vpop.f32.mrb[2].mxu0  ;;  %v601_v35 = vld [vmem:[%s3149_s2] sm:$0xf] }
 0x14f   :  { %v2426_v37 = vpop.f32.mrb[3].mxu0 }
 0x150   :  { %v150_v38 = vpop.f32.mrb[0].mxu1 }
 0x151   :  { %v151_v39 = vadd.f32 %v150_v38, %v94_v34  ;;  %v2431_v40 = vpop.f32.mrb[1].mxu1  ;;  %v2260_v34 = vld [vmem:[%s3149_s2 + $0x4] sm:$0xf] }
 0x152   :  { %v153_v41 = vpop.f32.mrb[2].mxu1 }
 0x153   :  { %v2432_v42 = vpop.f32.mrb[3].mxu1 }
 0x154   :  { %v209_v43 = vpop.f32.mrb[4].mxu0  ;;  %v2264_v42 = vld [vmem:[%s3149_s2 + $0x8] sm:$0xf] }
 0x155   :  { %v215_v44 = vadd.f32 %v209_v43, %v151_v39  ;;  %v2437_v45 = vpop.f32.mrb[5].mxu0  ;;  %v2266_v43 = vld [vmem:[%s3149_s2 + $0xc] sm:$0xf] }
 0x156   :  { %v212_v46 = vpop.f32.mrb[6].mxu0 }
 0x157   :  { %v2438_v47 = vpop.f32.mrb[7].mxu0 }
 0x158   :  { %v270_v48 = vpop.f32.mrb[4].mxu1 }
 0x159   :  { %v276_v49 = vadd.f32 %v270_v48, %v215_v44  ;;  %v2443_v50 = vpop.f32.mrb[5].mxu1 }
 0x15a   :  { %v273_v51 = vpop.f32.mrb[6].mxu1 }
 0x15b   :  { %v2444_v52 = vpop.f32.mrb[7].mxu1 }
 0x15c   :  { %v331_v53 = vpop.f32.mrb[8].mxu0  ;;  %v2268_v52 = vld [vmem:[%s3149_s2 + $0x10] sm:$0xf] }
 0x15d   :  { %v337_v54 = vadd.f32 %v331_v53, %v276_v49  ;;  %v2449_v55 = vpop.f32.mrb[9].mxu0  ;;  %v2270_v53 = vld [vmem:[%s3149_s2 + $0x14] sm:$0xf] }
 0x15e   :  { %v334_v56 = vpop.f32.mrb[10].mxu0 }
 0x15f   :  { %v2450_v57 = vpop.f32.mrb[11].mxu0 }
 0x160   :  { %v391_v58 = vpop.f32.mrb[8].mxu1 }
 0x161   :  { %v397_v59 = vadd.f32 %v391_v58, %v337_v54  ;;  %v2455_v60 = vpop.f32.mrb[9].mxu1 }
 0x162   :  { %v394_v61 = vpop.f32.mrb[10].mxu1  ;;  %v2272_v60 = vld [vmem:[%s3149_s2 + $0x18] sm:$0xf] }
 0x163   :  { %v2456_v62 = vpop.f32.mrb[11].mxu1  ;;  %v2276_v61 = vld [vmem:[%s3149_s2 + $0x1c] sm:$0xf] }
 0x164   :  { %v451_v63 = vpop.f32.mrb[12].mxu0 }
 0x165   :  { %v457_v0 = vadd.f32 %v451_v63, %v397_v59  ;;  %v2461_v2 = vpop.f32.mrb[13].mxu0 }
 0x166   :  { %v454_v3 = vpop.f32.mrb[14].mxu0 }
 0x167   :  { %v2462_v5 = vpop.f32.mrb[15].mxu0  ;;  %v2278_v3 = vld [vmem:[%s3149_s2 + $0x20] sm:$0xf] }
 0x168   :  { %v511_v6 = vpop.f32.mrb[12].mxu1  ;;  %v1082_v5 = vld [vmem:[%s3150_s3] sm:$0xf] }
 0x169   :  { %v517_v7 = vadd.f32 %v511_v6, %v457_v0  ;;  %v2467_v8 = vpop.f32.mrb[13].mxu1 }
 0x16a   :  { %v514_v9 = vpop.f32.mrb[14].mxu1 }
 0x16b   :  { %v2468_v10 = vpop.f32.mrb[15].mxu1 }
 0x16c   :  { %v571_v11 = vpop.f32.mrb[16].mxu0  ;;  %v2285_v10 = vld [vmem:[%s3147_s1 + $0x4] sm:$0xf] }
 0x16d   :  { %v577_v13 = vadd.f32 %v571_v11, %v517_v7  ;;  %v2473_v14 = vpop.f32.mrb[17].mxu0  ;;  %v1151_v11 = vld [vmem:[%s3147_s1] sm:$0xf] }
 0x16e   :  { %v574_v15 = vpop.f32.mrb[18].mxu0 }
 0x16f   :  { %v583_v16 = vadd.f32 %v2832_v12, %v577_v13  ;;  %v2474_v17 = vpop.f32.mrb[19].mxu0 }
 0x170   :  { %v2291_v17 = vld [vmem:[%s3147_s1 + $0x8] sm:$0xf] }
 0x171   :  { %v584_v19 = vmax.f32 %v583_v16, 0.0 }
 0x173   :  { %v591_v20 = vmul.f32 %v2838_v18, %v584_v19  ;;  %v2295_v19 = vld [vmem:[%s3147_s1 + $0xc] sm:$0xf] }
 0x175   :  { %v2343_v21 = vpack.c.bf16 %v591_v20, %v591_v20 }
 0x177   :  { %596 = vrot.lane.b32.xlu0 %v2343_v21, %s2677_s15 }
 0x1e9   :  { %v597_v22 = vpop.permute.xlu0 %596 }
 0x1ea   :  { %600 = vst.msk [vmem:[#allocation2] sm:$0xf] %vm599_vm7, %v597_v22 }
 0x1f1   :  { %v2664_v23 = vld [vmem:[#allocation2] ss:$0 sps:$4 sm:$0xff]  }
 0x1f2   :  { %658 = vrot.lane.b32.xlu0 %v2664_v23, %s2672_s26  ;;  %608 = vrot.lane.b32.xlu1 %v2664_v23, %s2673_s29  ;;  %v912_v24 = vld [vmem:[#allocation2] sm:$0xff] }
 0x1f3   :  { %v2274_v25 = vcombine.high %v912_v24, %v912_v24  ;;  %v2273_v26 = vcombine.low %v912_v24, %v912_v24  ;;  %v2299_v24 = vld [vmem:[%s3147_s1 + $0x10] sm:$0xf] }
 0x1f6   :  { %759 = vrot.lane.b32.xlu0 %v2664_v23, %s2674_s11  ;;  %708 = vrot.lane.b32.xlu1 %v2664_v23, %s2678_s6 }
 0x1fa   :  { %861 = vrot.lane.b32.xlu0 %v2664_v23, %s2679_s16  ;;  %810 = vrot.lane.b32.xlu1 %v2664_v23, %s2675_s12 }
 0x1fe   :  { %920 = vrot.lane.b32.xlu0 %v2274_v25, %s2680_s4  ;;  %918 = vrot.lane.b32.xlu1 %v2273_v26, %s2680_s4 }
 0x202   :  { %975 = vrot.lane.b32.xlu0 %v2274_v25, %s2681_s17  ;;  %973 = vrot.lane.b32.xlu1 %v2273_v26, %s2681_s17 }
 0x206   :  { %1030 = vrot.lane.b32.xlu0 %v2274_v25, %s2682_s18  ;;  %1028 = vrot.lane.b32.xlu1 %v2273_v26, %s2682_s18  ;;  %v2303_v25 = vld [vmem:[%s3147_s1 + $0x14] sm:$0xf] }
 0x20a   :  { %1091 = vrot.lane.b32.xlu1 %v2745_v4, %s2672_s26  ;;  %1163 = vrot.lane.b32.xlu0 %v2286_v27, %s2672_s26 }
 0x20e   :  { %1219 = vrot.lane.b32.xlu1 %v2288_v28, %s2672_s26  ;;  %1277 = vrot.lane.b32.xlu0 %v2288_v28, %s2673_s29 }
 0x212   :  { %1337 = vrot.lane.b32.xlu1 %v2296_v29, %s2672_s26  ;;  %1397 = vrot.lane.b32.xlu0 %v2872_v30, %s2672_s26 }
 0x216   :  { %1456 = vrot.lane.b32.xlu1 %v2296_v29, %s2673_s29  ;;  %1515 = vrot.lane.b32.xlu0 %v2288_v28, %s2674_s11  ;;  %v2307_v29 = vld [vmem:[%s3147_s1 + $0x18] sm:$0xf] }
 0x21a   :  { %1574 = vrot.lane.b32.xlu1 %v2286_v27, %s2674_s11  ;;  %1633 = vrot.lane.b32.xlu0 %v2288_v28, %s2675_s12 }
 0x264   :  { %v659_v4 = vpop.permute.xlu0 %658  ;;  %v609_v31 = vpop.permute.xlu1 %608 }
 0x265   :  { %v664_v32 = vsel %vm614_vm8, %v659_v4, 0  ;;  %v616_v33 = vsel %vm614_vm8, %v609_v31, 0  ;;  %v2311_v4 = vld [vmem:[%s3147_s1 + $0x1c] sm:$0xf] }
 0x266   :  { %2476 = vmatpush3.bf16.msra.mxu1 %v616_v33  ;;  %2482 = vmatpush3.bf16.msra.mxu0 %v664_v32  ;;  %v2315_v32 = vld [vmem:[%s3147_s1 + $0x20] sm:$0xf] }
 0x267   :  { %2487 = vmatprep.subr.bf16.mxu1 %v2670_v1  ;;  %2493 = vmatprep.subr.bf16.mxu0 %v2670_v1 }
 0x268   :  { %v760_v36 = vpop.permute.xlu0 %759  ;;  %v709_v37 = vpop.permute.xlu1 %708 }
 0x269   :  { %v765_v38 = vsel %vm614_vm8, %v760_v36, 0  ;;  %v714_v39 = vsel %vm614_vm8, %v709_v37, 0  ;;  %2478 = vmatmul.mubr.msk.bf16.vlgmr.msra.gmra.mrb[16].mxu1 %vm610_vm9, %v2260_v34  ;;  %2484 = vmatmul.mubr.msk.bf16.vlgmr.msra.gmra.mrb[20].mxu0 %vm610_vm9, %v601_v35 }
 0x26a   :  { %2488 = vmatpush3.bf16.msra.mxu1 %v714_v39  ;;  %2494 = vmatpush3.bf16.msra.mxu0 %v765_v38 }
 0x26b   :  { %2495 = vmatprep.mubr.msk.bf16.mxu0 %vm2671_vm0, %v2670_v1  ;;  %2505 = vmatprep.subr.bf16.mxu0 %v2670_v1 }
 0x26c   :  { %v862_v40 = vpop.permute.xlu0 %861  ;;  %v811_v41 = vpop.permute.xlu1 %810  ;;  %2489 = vmatprep.mubr.msk.bf16.mxu1 %vm2671_vm0, %v2670_v1  ;;  %2499 = vmatprep.subr.bf16.mxu1 %v2670_v1 }
 0x26d   :  { %v867_v46 = vsel %vm614_vm8, %v862_v40, 0  ;;  %v816_v47 = vsel %vm614_vm8, %v811_v41, 0 }
 0x270   :  { %v921_v44 = vpop.permute.xlu0 %920  ;;  %v919_v45 = vpop.permute.xlu1 %918 }
 0x271   :  { %2490 = vmatmul.mubr.msk.bf16.vlgmr.msra.gmra.mrb[20].mxu1 %vm610_vm9, %v2264_v42  ;;  %2496 = vmatmul.mubr.msk.bf16.vlgmr.msra.gmra.mrb[24].mxu0 %vm610_vm9, %v2266_v43  ;;  %v923_v50 = vsel %vm922_vm10, %v919_v45, %v921_v44 }
 0x272   :  { %2500 = vmatpush3.bf16.msra.mxu1 %v816_v47  ;;  %2506 = vmatpush3.bf16.msra.mxu0 %v867_v46  ;;  %v928_v55 = vsel %vm614_vm8, %v923_v50, 0 }
 0x273   :  { %2507 = vmatprep.mubr.msk.bf16.mxu0 %vm2671_vm0, %v2670_v1  ;;  %2517 = vmatprep.subr.bf16.mxu0 %v2670_v1 }
 0x274   :  { %v976_v48 = vpop.permute.xlu0 %975  ;;  %v974_v49 = vpop.permute.xlu1 %973  ;;  %2501 = vmatprep.mubr.msk.bf16.mxu1 %vm2671_vm0, %v2670_v1  ;;  %2511 = vmatprep.subr.bf16.mxu1 %v2670_v1 }
 0x275   :  { %v978_v51 = vsel %vm977_vm11, %v974_v49, %v976_v48 }
 0x276   :  { %v983_v56 = vsel %vm614_vm8, %v978_v51, 0 }
 0x278   :  { %v1029_v54 = vpop.permute.xlu1 %1028  ;;  %v1031_v57 = vpop.permute.xlu0 %1030 }
 0x279   :  { %2502 = vmatmul.mubr.msk.bf16.vlgmr.msra.gmra.mrb[24].mxu1 %vm610_vm9, %v2268_v52  ;;  %2508 = vmatmul.mubr.msk.bf16.vlgmr.msra.gmra.mrb[28].mxu0 %vm610_vm9, %v2270_v53  ;;  %v1033_v59 = vsel %vm1032_vm12, %v1029_v54, %v1031_v57 }
 0x27a   :  { %2512 = vmatpush3.bf16.msra.mxu1 %v928_v55  ;;  %2518 = vmatpush3.bf16.msra.mxu0 %v983_v56  ;;  %v1038_v63 = vsel %vm614_vm8, %v1033_v59, 0 }
 0x27b   :  { %2513 = vmatprep.mubr.msk.bf16.mxu1 %vm2671_vm0, %v2670_v1  ;;  %2519 = vmatprep.mubr.msk.bf16.mxu0 %vm2671_vm0, %v2670_v1 }
 0x27c   :  { %2523 = vmatprep.subr.bf16.mxu1 %v2670_v1  ;;  %v1092_v58 = vpop.permute.xlu1 %1091  ;;  %2529 = vmatprep.subr.bf16.mxu0 %v2670_v1  ;;  %v1164_v0 = vpop.permute.xlu0 %1163 }
 0x27d   :  { %v1097_v62 = vsel %vm56_vm1, %v1092_v58, 0  ;;  %v1169_v6 = vsel %vm56_vm1, %v1164_v0, 0 }
 0x280   :  { %v1220_v2 = vpop.permute.xlu1 %1219  ;;  %v1278_v8 = vpop.permute.xlu0 %1277 }
 0x281   :  { %2514 = vmatmul.mubr.msk.bf16.vlgmr.msra.gmra.mrb[28].mxu1 %vm610_vm9, %v2272_v60  ;;  %2520 = vmatmul.mubr.msk.bf16.vlgmr.msra.gmra.mrb[32].mxu0 %vm610_vm9, %v2276_v61  ;;  %v1225_v7 = vsel %vm56_vm1, %v1220_v2, 0  ;;  %v1283_v13 = vsel %vm56_vm1, %v1278_v8, 0 }
 0x282   :  { %2524 = vmatpush3.bf16.msra.mxu1 %v1038_v63  ;;  %2530 = vmatpush3.bf16.msra.mxu0 %v1097_v62 }
 0x283   :  { %2525 = vmatprep.mubr.msk.bf16.mxu1 %vm2671_vm0, %v2670_v1  ;;  %2531 = vmatprep.mubr.msk.bf16.mxu0 %vm2671_vm0, %v2670_v1 }
 0x284   :  { %2535 = vmatprep.subr.bf16.mxu1 %v2670_v1  ;;  %2541 = vmatprep.subr.bf16.mxu0 %v2670_v1  ;;  %v1338_v9 = vpop.permute.xlu1 %1337  ;;  %v1398_v15 = vpop.permute.xlu0 %1397 }
 0x285   :  { %v1343_v14 = vsel %vm56_vm1, %v1338_v9, 0  ;;  %v1403_v20 = vsel %vm56_vm1, %v1398_v15, 0 }
 0x288   :  { %v1457_v16 = vpop.permute.xlu1 %1456  ;;  %v1516_v22 = vpop.permute.xlu0 %1515 }
 0x289   :  { %2526 = vmatmul.mubr.msk.bf16.vlgmr.msra.gmra.mrb[32].mxu1 %vm610_vm9, %v2278_v3  ;;  %2532 = vmatmul.mubr.msk.bf16.vlgmr.msra.gmra.mrb[36].mxu0 %vm52_vm2, %v1082_v5  ;;  %v1462_v21 = vsel %vm56_vm1, %v1457_v16, 0  ;;  %v1521_v26 = vsel %vm56_vm1, %v1516_v22, 0 }
 0x28a   :  { %2536 = vmatpush3.bf16.msra.mxu1 %v1169_v6  ;;  %2542 = vmatpush3.bf16.msra.mxu0 %v1225_v7 }
 0x28b   :  { %2537 = vmatprep.mubr.msk.bf16.mxu1 %vm2671_vm0, %v2670_v1  ;;  %2543 = vmatprep.mubr.msk.bf16.mxu0 %vm2671_vm0, %v2670_v1 }
 0x28c   :  { %2547 = vmatprep.subr.bf16.mxu1 %v2670_v1  ;;  %2553 = vmatprep.subr.bf16.mxu0 %v2670_v1  ;;  %v1575_v23 = vpop.permute.xlu1 %1574  ;;  %v1634_v28 = vpop.permute.xlu0 %1633 }
 0x28d   :  { %v1580_v27 = vsel %vm56_vm1, %v1575_v23, 0  ;;  %v1639_v31 = vsel %vm56_vm1, %v1634_v28, 0 }
 0x291   :  { %2538 = vmatmul.mubr.msk.bf16.vlgmr.msra.gmra.mrb[36].mxu1 %vm52_vm2, %v2285_v10  ;;  %2544 = vmatmul.mubr.msk.bf16.vlgmr.msra.gmra.mrb[40].mxu0 %vm52_vm2, %v1151_v11 }
 0x292   :  { %2548 = vmatpush3.bf16.msra.mxu1 %v1283_v13  ;;  %2549 = vmatprep.mubr.msk.bf16.mxu1 %vm2671_vm0, %v2670_v1 }
 0x293   :  { %2554 = vmatpush3.bf16.msra.mxu0 %v1343_v14  ;;  %2555 = vmatprep.mubr.msk.bf16.mxu0 %vm2671_vm0, %v2670_v1 }
 0x294   :  { %2559 = vmatprep.subr.bf16.mxu1 %v2670_v1  ;;  %2565 = vmatprep.subr.bf16.mxu0 %v2670_v1 }
 0x299   :  { %2550 = vmatmul.mubr.msk.bf16.vlgmr.msra.gmra.mrb[40].mxu1 %vm52_vm2, %v2291_v17  ;;  %2556 = vmatmul.mubr.msk.bf16.vlgmr.msra.gmra.mrb[44].mxu0 %vm52_vm2, %v2295_v19 }
 0x29a   :  { %2560 = vmatpush3.bf16.msra.mxu1 %v1403_v20  ;;  %2561 = vmatprep.mubr.msk.bf16.mxu1 %vm2671_vm0, %v2670_v1 }
 0x29b   :  { %2566 = vmatpush3.bf16.msra.mxu0 %v1462_v21  ;;  %2567 = vmatprep.mubr.msk.bf16.mxu0 %vm2671_vm0, %v2670_v1 }
 0x29c   :  { %2571 = vmatprep.subr.bf16.mxu1 %v2670_v1  ;;  %2577 = vmatprep.subr.bf16.mxu0 %v2670_v1 }
 0x2a1   :  { %2562 = vmatmul.mubr.msk.bf16.vlgmr.msra.gmra.mrb[44].mxu1 %vm52_vm2, %v2299_v24  ;;  %2568 = vmatmul.mubr.msk.bf16.vlgmr.msra.gmra.mrb[48].mxu0 %vm52_vm2, %v2303_v25 }
 0x2a2   :  { %2572 = vmatpush3.bf16.msra.mxu1 %v1521_v26  ;;  %2573 = vmatprep.mubr.msk.bf16.mxu1 %vm2671_vm0, %v2670_v1 }
 0x2a3   :  { %2578 = vmatpush3.bf16.msra.mxu0 %v1580_v27  ;;  %2579 = vmatprep.mubr.msk.bf16.mxu0 %vm2671_vm0, %v2670_v1 }
 0x2a4   :  { %2583 = vmatprep.subr.bf16.mxu1 %v2670_v1  ;;  %2589 = vmatprep.subr.bf16.mxu0 %v2670_v1 }
 0x2a9   :  { %2574 = vmatmul.mubr.msk.bf16.vlgmr.msra.gmra.mrb[48].mxu1 %vm52_vm2, %v2307_v29  ;;  %2580 = vmatmul.mubr.msk.bf16.vlgmr.msra.gmra.mrb[52].mxu0 %vm52_vm2, %v2311_v4 }
 0x2aa   :  { %2584 = vmatpush3.bf16.msra.mxu1 %v1639_v31  ;;  %2585 = vmatprep.mubr.msk.bf16.mxu1 %vm2671_vm0, %v2670_v1 }
 0x2ab   :  { %2595 = vmatprep.subr.bf16.mxu1 %v2670_v1  ;;  %2591 = vmatprep.mubr.msk.bf16.mxu0 %vm2671_vm0, %v2670_v1 }
 0x2b1   :  { %2586 = vmatmul.mubr.msk.bf16.vlgmr.msra.gmra.mrb[52].mxu1 %vm52_vm2, %v2315_v32 }
 0x2b2   :  { %2597 = vmatprep.mubr.msk.bf16.mxu1 %vm2671_vm0, %v2670_v1 }
 0x33c   :  { %v652_v33 = vpop.f32.mrb[16].mxu1  ;;  %v700_v34 = vpop.f32.mrb[20].mxu0 }
 0x33d   :  { %v701_v35 = vadd.f32 %v700_v34, %v652_v33  ;;  %v2479_v36 = vpop.f32.mrb[17].mxu1  ;;  %v2485_v37 = vpop.f32.mrb[21].mxu0 }
 0x33e   :  { %v655_v38 = vpop.f32.mrb[18].mxu1  ;;  %v703_v39 = vpop.f32.mrb[22].mxu0 }
 0x33f   :  { %v2480_v40 = vpop.f32.mrb[19].mxu1  ;;  %v2486_v41 = vpop.f32.mrb[23].mxu0 }
 0x344   :  { %v750_v42 = vpop.f32.mrb[20].mxu1  ;;  %v801_v43 = vpop.f32.mrb[24].mxu0 }
 0x345   :  { %v756_v44 = vadd.f32 %v750_v42, %v701_v35  ;;  %v2491_v45 = vpop.f32.mrb[21].mxu1  ;;  %v2497_v46 = vpop.f32.mrb[25].mxu0 }
 0x346   :  { %v753_v47 = vpop.f32.mrb[22].mxu1  ;;  %v804_v48 = vpop.f32.mrb[26].mxu0 }
 0x347   :  { %v807_v49 = vadd.f32 %v801_v43, %v756_v44  ;;  %v2492_v50 = vpop.f32.mrb[23].mxu1  ;;  %v2498_v51 = vpop.f32.mrb[27].mxu0 }
 0x34c   :  { %v852_v52 = vpop.f32.mrb[24].mxu1  ;;  %v903_v53 = vpop.f32.mrb[28].mxu0 }
 0x34d   :  { %v858_v54 = vadd.f32 %v852_v52, %v807_v49  ;;  %v2503_v55 = vpop.f32.mrb[25].mxu1  ;;  %v2509_v56 = vpop.f32.mrb[29].mxu0 }
 0x34e   :  { %v855_v57 = vpop.f32.mrb[26].mxu1  ;;  %v906_v58 = vpop.f32.mrb[30].mxu0 }
 0x34f   :  { %v909_v59 = vadd.f32 %v903_v53, %v858_v54  ;;  %v2504_v60 = vpop.f32.mrb[27].mxu1  ;;  %v2510_v61 = vpop.f32.mrb[31].mxu0 }
 0x354   :  { %v964_v62 = vpop.f32.mrb[28].mxu1  ;;  %v1019_v63 = vpop.f32.mrb[32].mxu0 }
 0x355   :  { %v970_v0 = vadd.f32 %v964_v62, %v909_v59  ;;  %v2515_v2 = vpop.f32.mrb[29].mxu1  ;;  %v2521_v3 = vpop.f32.mrb[33].mxu0 }
 0x356   :  { %v967_v5 = vpop.f32.mrb[30].mxu1  ;;  %v1022_v6 = vpop.f32.mrb[34].mxu0 }
 0x357   :  { %v1025_v7 = vadd.f32 %v1019_v63, %v970_v0  ;;  %v2516_v8 = vpop.f32.mrb[31].mxu1  ;;  %v2522_v9 = vpop.f32.mrb[35].mxu0 }
 0x35c   :  { %v1074_v10 = vpop.f32.mrb[32].mxu1  ;;  %v1133_v11 = vpop.f32.mrb[36].mxu0 }
 0x35d   :  { %v1080_v13 = vadd.f32 %v1074_v10, %v1025_v7  ;;  %v2527_v14 = vpop.f32.mrb[33].mxu1  ;;  %v2533_v15 = vpop.f32.mrb[37].mxu0 }
 0x35e   :  { %v1077_v16 = vpop.f32.mrb[34].mxu1  ;;  %v1136_v17 = vpop.f32.mrb[38].mxu0 }
 0x35f   :  { %v3036_v19 = vadd.f32 %v1133_v11, %v1080_v13  ;;  %v2528_v20 = vpop.f32.mrb[35].mxu1  ;;  %v2534_v21 = vpop.f32.mrb[39].mxu0  ;;  %v35_v11 = vld [vmem:[%s3151_s5] sm:$0xff] }
 0x360   :  { %v2319_v17 = vld [vmem:[%s3149_s2 + $0x4] sm:$0xf]  ;;  %v1693_v20 = vld [vmem:[%s3149_s2] sm:$0xf] }
 0x364   :  { %v1205_v22 = vpop.f32.mrb[36].mxu1  ;;  %v1261_v23 = vpop.f32.mrb[40].mxu0 }
 0x365   :  { %v1262_v24 = vadd.f32 %v1261_v23, %v1205_v22  ;;  %v2539_v25 = vpop.f32.mrb[37].mxu1  ;;  %v2545_v26 = vpop.f32.mrb[41].mxu0 }
 0x366   :  { %v1208_v27 = vpop.f32.mrb[38].mxu1  ;;  %v1264_v28 = vpop.f32.mrb[42].mxu0  ;;  %v2323_v26 = vld [vmem:[%s3149_s2 + $0x8] sm:$0xf] }
 0x367   :  { %v2540_v29 = vpop.f32.mrb[39].mxu1  ;;  %v2546_v4 = vpop.f32.mrb[43].mxu0  ;;  %v2325_v27 = vld [vmem:[%s3149_s2 + $0xc] sm:$0xf] }
 0x36c   :  { %v1319_v31 = vpop.f32.mrb[40].mxu1  ;;  %v1379_v32 = vpop.f32.mrb[44].mxu0 }
 0x36d   :  { %v1325_v33 = vadd.f32 %v1319_v31, %v1262_v24  ;;  %v2551_v34 = vpop.f32.mrb[41].mxu1  ;;  %v2557_v35 = vpop.f32.mrb[45].mxu0 }
 0x36e   :  { %v1322_v36 = vpop.f32.mrb[42].mxu1  ;;  %v1382_v37 = vpop.f32.mrb[46].mxu0 }
 0x36f   :  { %v1385_v38 = vadd.f32 %v1379_v32, %v1325_v33  ;;  %v2552_v39 = vpop.f32.mrb[43].mxu1  ;;  %v2558_v40 = vpop.f32.mrb[47].mxu0  ;;  %v2327_v36 = vld [vmem:[%s3149_s2 + $0x10] sm:$0xf]  ;;  %v2329_v37 = vld [vmem:[%s3149_s2 + $0x14] sm:$0xf] }
 0x374   :  { %v1439_v41 = vpop.f32.mrb[44].mxu1  ;;  %v1498_v42 = vpop.f32.mrb[48].mxu0 }
 0x375   :  { %v1445_v43 = vadd.f32 %v1439_v41, %v1385_v38  ;;  %v2563_v44 = vpop.f32.mrb[45].mxu1  ;;  %v2569_v45 = vpop.f32.mrb[49].mxu0 }
 0x376   :  { %v1442_v46 = vpop.f32.mrb[46].mxu1  ;;  %v1501_v47 = vpop.f32.mrb[50].mxu0  ;;  %v2331_v44 = vld [vmem:[%s3149_s2 + $0x18] sm:$0xf]  ;;  %v2335_v45 = vld [vmem:[%s3149_s2 + $0x1c] sm:$0xf] }
 0x377   :  { %v1504_v48 = vadd.f32 %v1498_v42, %v1445_v43  ;;  %v2564_v49 = vpop.f32.mrb[47].mxu1  ;;  %v2570_v50 = vpop.f32.mrb[51].mxu0 }
 0x378   :  { %v2161_v49 = vld [vmem:[%s3150_s3] sm:$0xf] }
 0x37c   :  { %v1557_v51 = vpop.f32.mrb[48].mxu1  ;;  %v1616_v52 = vpop.f32.mrb[52].mxu0 }
 0x37d   :  { %v1563_v53 = vadd.f32 %v1557_v51, %v1504_v48  ;;  %v2575_v54 = vpop.f32.mrb[49].mxu1  ;;  %v2581_v55 = vpop.f32.mrb[53].mxu0  ;;  %v2337_v48 = vld [vmem:[%s3149_s2 + $0x20] sm:$0xf] }
 0x37e   :  { %v1560_v56 = vpop.f32.mrb[50].mxu1  ;;  %v1619_v57 = vpop.f32.mrb[54].mxu0 }
 0x37f   :  { %v1622_v58 = vadd.f32 %v1616_v52, %v1563_v53  ;;  %v2576_v59 = vpop.f32.mrb[51].mxu1  ;;  %v2582_v60 = vpop.f32.mrb[55].mxu0 }
 0x384   :  { %v1675_v61 = vpop.f32.mrb[52].mxu1 }
 0x385   :  { %v1681_v62 = vadd.f32 %v1675_v61, %v1622_v58  ;;  %v2587_v63 = vpop.f32.mrb[53].mxu1 }
 0x386   :  { %v1678_v0 = vpop.f32.mrb[54].mxu1 }
 0x387   :  { %v1682_v2 = vadd.f32 %v1681_v62, %v2832_v12  ;;  %v2588_v3 = vpop.f32.mrb[55].mxu1 }
 0x389   :  { %v1683_v5 = vmax.f32 %v1682_v2, 0.0 }
 0x38b   :  { %v1684_v6 = vmul.f32 %v2838_v18, %v1683_v5 }
 0x38d   :  { %v2344_v7 = vpack.c.bf16 %v1684_v6, %v1684_v6 }
 0x38f   :  { %1689 = vrot.lane.b32.xlu1 %v2344_v7, %s2677_s15 }
 0x401   :  { %v1690_v8 = vpop.permute.xlu1 %1689 }
 0x402   :  { %1692 = vst.msk [vmem:[#allocation2] sm:$0xf] %vm599_vm7, %v1690_v8 }
 0x409   :  { %v2667_v9 = vld [vmem:[#allocation2] ss:$0 sps:$4 sm:$0xff]  }
 0x40a   :  { %1747 = vrot.lane.b32.xlu1 %v2667_v9, %s2672_s26  ;;  %1699 = vrot.lane.b32.xlu0 %v2667_v9, %s2673_s29  ;;  %v1996_v12 = vld [vmem:[#allocation2] sm:$0xff] }
 0x40b   :  { %v2333_v18 = vcombine.high %v1996_v12, %v1996_v12  ;;  %v2332_v10 = vcombine.low %v1996_v12, %v1996_v12 }
 0x40e   :  { %1846 = vrot.lane.b32.xlu1 %v2667_v9, %s2674_s11  ;;  %1796 = vrot.lane.b32.xlu0 %v2667_v9, %s2678_s6 }
 0x412   :  { %1946 = vrot.lane.b32.xlu1 %v2667_v9, %s2679_s16  ;;  %1896 = vrot.lane.b32.xlu0 %v2667_v9, %s2675_s12 }
 0x416   :  { %2004 = vrot.lane.b32.xlu1 %v2333_v18, %s2680_s4  ;;  %2002 = vrot.lane.b32.xlu0 %v2332_v10, %s2680_s4 }
 0x41a   :  { %2057 = vrot.lane.b32.xlu1 %v2333_v18, %s2681_s17  ;;  %2055 = vrot.lane.b32.xlu0 %v2332_v10, %s2681_s17 }
 0x41e   :  { %2110 = vrot.lane.b32.xlu1 %v2333_v18, %s2682_s18  ;;  %2108 = vrot.lane.b32.xlu0 %v2332_v10, %s2682_s18 }
 0x422   :  { %1142 = vperm.xlu1 %2662, %v35_v11   ;;  %2170 = vrot.lane.b32.xlu0 %v2872_v30, %s2672_s26 }
 0x47c   :  { %v1748_v13 = vpop.permute.xlu1 %1747  ;;  %v1700_v14 = vpop.permute.xlu0 %1699 }
 0x47d   :  { %v1753_v15 = vsel %vm614_vm8, %v1748_v13, 0  ;;  %v1705_v16 = vsel %vm614_vm8, %v1700_v14, 0 }
 0x47e   :  { %2590 = vmatpush3.bf16.msra.mxu0 %v1705_v16  ;;  %2596 = vmatpush3.bf16.msra.mxu1 %v1753_v15 }
 0x47f   :  { %2601 = vmatprep.subr.bf16.mxu0 %v2670_v1  ;;  %2607 = vmatprep.subr.bf16.mxu1 %v2670_v1 }
 0x480   :  { %v1847_v30 = vpop.permute.xlu1 %1846  ;;  %v1797_v21 = vpop.permute.xlu0 %1796 }
 0x481   :  { %v1852_v22 = vsel %vm614_vm8, %v1847_v30, 0  ;;  %v1802_v23 = vsel %vm614_vm8, %v1797_v21, 0  ;;  %2592 = vmatmul.mubr.msk.bf16.vlgmr.msra.gmra.mrb[56].mxu0 %vm610_vm9, %v2319_v17  ;;  %2598 = vmatmul.mubr.msk.bf16.vlgmr.msra.gmra.mrb[56].mxu1 %vm610_vm9, %v1693_v20 }
 0x482   :  { %2602 = vmatpush3.bf16.msra.mxu0 %v1802_v23  ;;  %2608 = vmatpush3.bf16.msra.mxu1 %v1852_v22 }
 0x483   :  { %2609 = vmatprep.mubr.msk.bf16.mxu1 %vm2671_vm0, %v2670_v1  ;;  %2619 = vmatprep.subr.bf16.mxu1 %v2670_v1 }
 0x484   :  { %v1947_v24 = vpop.permute.xlu1 %1946  ;;  %v1897_v25 = vpop.permute.xlu0 %1896  ;;  %2603 = vmatprep.mubr.msk.bf16.mxu0 %vm2671_vm0, %v2670_v1  ;;  %2613 = vmatprep.subr.bf16.mxu0 %v2670_v1 }
 0x485   :  { %v1952_v4 = vsel %vm614_vm8, %v1947_v24, 0  ;;  %v1902_v31 = vsel %vm614_vm8, %v1897_v25, 0 }
 0x488   :  { %v2005_v28 = vpop.permute.xlu1 %2004  ;;  %v2003_v29 = vpop.permute.xlu0 %2002 }
 0x489   :  { %2604 = vmatmul.mubr.msk.bf16.vlgmr.msra.gmra.mrb[60].mxu0 %vm610_vm9, %v2323_v26  ;;  %2610 = vmatmul.mubr.msk.bf16.vlgmr.msra.gmra.mrb[60].mxu1 %vm610_vm9, %v2325_v27  ;;  %v2006_v34 = vsel %vm922_vm10, %v2003_v29, %v2005_v28 }
 0x48a   :  { %2614 = vmatpush3.bf16.msra.mxu0 %v1902_v31  ;;  %2620 = vmatpush3.bf16.msra.mxu1 %v1952_v4  ;;  %v2011_v38 = vsel %vm614_vm8, %v2006_v34, 0 }
 0x48b   :  { %2621 = vmatprep.mubr.msk.bf16.mxu1 %vm2671_vm0, %v2670_v1  ;;  %2631 = vmatprep.subr.bf16.mxu1 %v2670_v1 }
 0x48c   :  { %v2058_v32 = vpop.permute.xlu1 %2057  ;;  %v2056_v33 = vpop.permute.xlu0 %2055  ;;  %2615 = vmatprep.mubr.msk.bf16.mxu0 %vm2671_vm0, %v2670_v1  ;;  %2625 = vmatprep.subr.bf16.mxu0 %v2670_v1 }
 0x48d   :  { %v2059_v35 = vsel %vm977_vm11, %v2056_v33, %v2058_v32 }
 0x48e   :  { %v2064_v39 = vsel %vm614_vm8, %v2059_v35, 0 }
 0x490   :  { %v2109_v40 = vpop.permute.xlu0 %2108  ;;  %v2111_v41 = vpop.permute.xlu1 %2110 }
 0x491   :  { %2616 = vmatmul.mubr.msk.bf16.vlgmr.msra.gmra.mrb[64].mxu0 %vm610_vm9, %v2327_v36  ;;  %2622 = vmatmul.mubr.msk.bf16.vlgmr.msra.gmra.mrb[64].mxu1 %vm610_vm9, %v2329_v37  ;;  %v2112_v43 = vsel %vm1032_vm12, %v2109_v40, %v2111_v41 }
 0x492   :  { %2626 = vmatpush3.bf16.msra.mxu0 %v2011_v38  ;;  %2632 = vmatpush3.bf16.msra.mxu1 %v2064_v39  ;;  %v2117_v47 = vsel %vm614_vm8, %v2112_v43, 0 }
 0x493   :  { %2627 = vmatprep.mubr.msk.bf16.mxu0 %vm2671_vm0, %v2670_v1  ;;  %2637 = vmatprep.subr.bf16.mxu0 %v2670_v1 }
 0x494   :  { %2633 = vmatprep.mubr.msk.bf16.mxu1 %vm2671_vm0, %v2670_v1  ;;  %2643 = vmatprep.subr.bf16.mxu1 %v2670_v1  ;;  %v2171_v42 = vpop.permute.xlu0 %2170 }
 0x495   :  { %v2176_v46 = vsel %vm56_vm1, %v2171_v42, 0 }
 0x499   :  { %2628 = vmatmul.mubr.msk.bf16.vlgmr.msra.gmra.mrb[68].mxu0 %vm610_vm9, %v2331_v44  ;;  %2634 = vmatmul.mubr.msk.bf16.vlgmr.msra.gmra.mrb[68].mxu1 %vm610_vm9, %v2335_v45 }
 0x49a   :  { %2638 = vmatpush3.bf16.msra.mxu0 %v2117_v47  ;;  %2639 = vmatprep.mubr.msk.bf16.mxu0 %vm2671_vm0, %v2670_v1 }
 0x49b   :  { %2644 = vmatpush3.bf16.msra.mxu1 %v2176_v46  ;;  %2645 = vmatprep.mubr.msk.bf16.mxu1 %vm2671_vm0, %v2670_v1 }
 0x4a1   :  { %v1143_v50 = vpop.permute.xlu1 %1142  ;;  %2640 = vmatmul.mubr.msk.bf16.vlgmr.msra.gmra.mrb[72].mxu0 %vm610_vm9, %v2337_v48  ;;  %2646 = vmatmul.mubr.msk.bf16.vlgmr.msra.gmra.mrb[72].mxu1 %vm52_vm2, %v2161_v49 }
 0x4a2   :  { %v1145_v51 = vadd.f32 %v1143_v50, %v3036_v19 }
 0x4a4   :  { %v1146_v52 = vmax.f32 %v1145_v51, 0.0 }
 0x4a6   :  { %1148 = vst.msk [vmem:[%s3152_s7] sm:$0xff] %vm1147_vm13, %v1146_v52 }
 0x554   :  { %v1741_v1 = vpop.f32.mrb[56].mxu0  ;;  %v1789_v53 = vpop.f32.mrb[56].mxu1 }
 0x555   :  { %v2593_v54 = vpop.f32.mrb[57].mxu0  ;;  %v1790_v55 = vadd.f32 %v1789_v53, %v1741_v1  ;;  %v2599_v56 = vpop.f32.mrb[57].mxu1 }
 0x556   :  { %v1744_v57 = vpop.f32.mrb[58].mxu0  ;;  %v1792_v58 = vpop.f32.mrb[58].mxu1 }
 0x557   :  { %v2594_v59 = vpop.f32.mrb[59].mxu0  ;;  %v2600_v60 = vpop.f32.mrb[59].mxu1 }
 0x55c   :  { %v1838_v61 = vpop.f32.mrb[60].mxu0  ;;  %v1888_v62 = vpop.f32.mrb[60].mxu1 }
 0x55d   :  { %v1844_v63 = vadd.f32 %v1838_v61, %v1790_v55  ;;  %v2605_v19 = vpop.f32.mrb[61].mxu0  ;;  %v2611_v0 = vpop.f32.mrb[61].mxu1 }
 0x55e   :  { %v1841_v2 = vpop.f32.mrb[62].mxu0  ;;  %v1891_v3 = vpop.f32.mrb[62].mxu1 }
 0x55f   :  { %v1894_v5 = vadd.f32 %v1888_v62, %v1844_v63  ;;  %v2606_v6 = vpop.f32.mrb[63].mxu0  ;;  %v2612_v7 = vpop.f32.mrb[63].mxu1 }
 0x564   :  { %v1938_v8 = vpop.f32.mrb[64].mxu0  ;;  %v1988_v9 = vpop.f32.mrb[64].mxu1 }
 0x565   :  { %v1944_v12 = vadd.f32 %v1938_v8, %v1894_v5  ;;  %v2617_v18 = vpop.f32.mrb[65].mxu0  ;;  %v2623_v10 = vpop.f32.mrb[65].mxu1 }
 0x566   :  { %v1941_v11 = vpop.f32.mrb[66].mxu0  ;;  %v1991_v13 = vpop.f32.mrb[66].mxu1 }
 0x567   :  { %v1994_v14 = vadd.f32 %v1988_v9, %v1944_v12  ;;  %v2618_v15 = vpop.f32.mrb[67].mxu0  ;;  %v2624_v16 = vpop.f32.mrb[67].mxu1 }
 0x56c   :  { %v2047_v17 = vpop.f32.mrb[68].mxu0  ;;  %v2100_v20 = vpop.f32.mrb[68].mxu1 }
 0x56d   :  { %v2053_v30 = vadd.f32 %v2047_v17, %v1994_v14  ;;  %v2629_v21 = vpop.f32.mrb[69].mxu0  ;;  %v2635_v22 = vpop.f32.mrb[69].mxu1 }
 0x56e   :  { %v2050_v23 = vpop.f32.mrb[70].mxu0  ;;  %v2103_v24 = vpop.f32.mrb[70].mxu1 }
 0x56f   :  { %v2106_v25 = vadd.f32 %v2100_v20, %v2053_v30  ;;  %v2630_v26 = vpop.f32.mrb[71].mxu0  ;;  %v2636_v27 = vpop.f32.mrb[71].mxu1 }
 0x574   :  { %v2153_v28 = vpop.f32.mrb[72].mxu0  ;;  %v2212_v29 = vpop.f32.mrb[72].mxu1 }
 0x575   :  { %v2159_v4 = vadd.f32 %v2153_v28, %v2106_v25  ;;  %v2641_v31 = vpop.f32.mrb[73].mxu0  ;;  %v2647_v32 = vpop.f32.mrb[73].mxu1 }
 0x576   :  { %v2156_v33 = vpop.f32.mrb[74].mxu0  ;;  %v2215_v34 = vpop.f32.mrb[74].mxu1 }
 0x577   :  { %v2218_v35 = vadd.f32 %v2212_v29, %v2159_v4  ;;  %v2642_v36 = vpop.f32.mrb[75].mxu0  ;;  %v2648_v37 = vpop.f32.mrb[75].mxu1 }
 0x579   :  { %v2219_v38 = vadd.f32 %v2218_v35, %v1143_v50 }
 0x57b   :  { %v2220_v39 = vmax.f32 %v2219_v38, 0.0 }
 0x57d   :  { %2342 = vst.msk [vmem:[%s3152_s7 + $0x8] sm:$0xff] %vm1147_vm13, %v2220_v39 }

</bundles_post_ra>
